<compile_context>
chip_gen: v7x
topology: tpu7x:2x2x1
jax: 0.10.0
libtpu: 0.0.40
codegen_flags: <defaults>
</compile_context>

<pallas_src>
import numpy as np
import jax
import jax.numpy as jnp
from jax.experimental import pallas as pl
from jax.experimental.pallas import tpu as pltpu


# ----------------------------------------------------------------------------
# Fused per-batch temporal kernel:
#   input 1x1 projection (VPU) + positional encoding
#   + single-head post-norm transformer encoder layer (fused QKV, relu FFN)
#   + observed/missing mix + temporal mean (for the graph stage)
# One grid step per batch element; all V sequences handled with batched math.
# ----------------------------------------------------------------------------
def _encoder_kernel(value_ref, mask_ref, pe_ref, pad_ref,
                    w_qkv_ref, b_qkv_ref, w_other_ref, vec_ref,
                    xmean_ref):
    VT = value_ref.shape[1]            # V * T
    T = pe_ref.shape[1]
    V = VT // T
    D = w_qkv_ref.shape[0]

    val2 = value_ref[0]                # (VT, 1)
    obs2 = mask_ref[0]                 # (VT, 1)
    pe = pe_ref[0]                     # (T, D)
    pad = pad_ref[0]                   # (1, T)   1.0 -> padded key
    vec = vec_ref[...]                 # (10, D) packed vectors

    w_in0, w_in1 = vec[0:1, :], vec[1:2, :]
    b_in = vec[2:3, :]
    bo, b1, b2 = vec[3:4, :], vec[4:5, :], vec[5:6, :]
    g1, be1 = vec[6:7, :], vec[7:8, :]
    g2, be2 = vec[8:9, :], vec[9:10, :]

    # ---- input projection (depth-2 contraction on the VPU) + pos. encoding ----
    pe2 = jnp.broadcast_to(pe[None, :, :], (V, T, D)).reshape(VT, D)
    x2 = val2 * w_in0 + obs2 * w_in1 + b_in + pe2                   # (VT, D)

    # ---- fused QKV projection: single (VT, D) @ (D, 3D) MXU matmul ----
    qkv = jnp.dot(x2, w_qkv_ref[...], preferred_element_type=jnp.float32)
    qkv = (qkv + b_qkv_ref[...]).reshape(V, T, 3 * D)
    q = qkv[:, :, :D]
    k = qkv[:, :, D:2 * D]
    v = qkv[:, :, 2 * D:]

    # ---- scaled dot-product attention with key-padding mask (finite mask) ----
    scores = jnp.einsum('vqd,vkd->vqk', q, k,
                        preferred_element_type=jnp.float32)
    scores = scores * (1.0 / float(np.sqrt(D)))
    scores = jnp.where(pad[None, :, :] > 0.5, jnp.float32(-1e30), scores)

    m = jnp.max(scores, axis=-1, keepdims=True)
    p = jnp.exp(scores - m)
    attn = p * pl.reciprocal(jnp.sum(p, axis=-1, keepdims=True), approx=True)

    ctx = jnp.einsum('vqk,vkd->vqd', attn, v,
                     preferred_element_type=jnp.float32).reshape(VT, D)

    wo = w_other_ref[:, :D]
    w1 = w_other_ref[:, D:2 * D]
    w2 = w_other_ref[:, 2 * D:]

    attn_out = jnp.dot(ctx, wo, preferred_element_type=jnp.float32) + bo

    # ---- residual + LayerNorm1 (eps = 1e-5) ----
    h = x2 + attn_out
    mu = jnp.mean(h, axis=-1, keepdims=True)
    var = jnp.mean((h - mu) ** 2, axis=-1, keepdims=True)
    h = (h - mu) * jax.lax.rsqrt(var + 1e-5) * g1 + be1

    # ---- feed-forward (relu) ----
    ff = jnp.maximum(jnp.dot(h, w1, preferred_element_type=jnp.float32) + b1, 0.0)
    ff = jnp.dot(ff, w2, preferred_element_type=jnp.float32) + b2

    # ---- residual + LayerNorm2 ----
    h2 = h + ff
    mu2 = jnp.mean(h2, axis=-1, keepdims=True)
    var2 = jnp.mean((h2 - mu2) ** 2, axis=-1, keepdims=True)
    out2 = (h2 - mu2) * jax.lax.rsqrt(var2 + 1e-5) * g2 + be2

    # ---- fused epilogue: x_TAt mix + mean over time (input to graph stage) ----
    x_tat = obs2 * x2 + (1.0 - obs2) * out2                         # (VT, D)
    xmean_ref[0] = jnp.mean(x_tat.reshape(V, T, D), axis=1).astype(xmean_ref.dtype)


def fused_temporal_encoder(value_col, obs_col, pe_b, pad, tfp):
    B, VT, _ = value_col.shape
    T = pe_b.shape[1]
    D = tfp["w_qkv"].shape[0]
    V = VT // T
    return pl.pallas_call(
        _encoder_kernel,
        out_shape=jax.ShapeDtypeStruct((B, V, D), jnp.float32),
        grid=(B,),
        in_specs=[
            pl.BlockSpec((1, VT, 1), lambda b: (b, 0, 0)),
            pl.BlockSpec((1, VT, 1), lambda b: (b, 0, 0)),
            pl.BlockSpec((1, T, D), lambda b: (b, 0, 0)),
            pl.BlockSpec((1, 1, T), lambda b: (b, 0, 0)),
            pl.BlockSpec(tfp["w_qkv"].shape, lambda b: (0, 0)),
            pl.BlockSpec(tfp["b_qkv"].shape, lambda b: (0, 0)),
            pl.BlockSpec(tfp["w_other"].shape, lambda b: (0, 0)),
            pl.BlockSpec(tfp["vecs"].shape, lambda b: (0, 0)),
        ],
        out_specs=pl.BlockSpec((1, V, D), lambda b: (b, 0, 0)),
        compiler_params=pltpu.CompilerParams(
            dimension_semantics=("parallel",),
            # explicit limit: safe across v5e/v6e (128 MiB) and v7x (64 MiB)
            vmem_limit_bytes=32 * 1024 * 1024),
    )(value_col, obs_col, pe_b, pad,
      tfp["w_qkv"], tfp["b_qkv"], tfp["w_other"], tfp["vecs"])


# ----------------------------------------------------------------------------
# Fused tail kernel (whole batch, single launch):
#   Variable_Attention_layer  softmax(relu((xWQ)(xWK)^T)/sqrt(d_model))
#   + adjacency: batch-mean + symmetrize + softmax + symmetrize
#   + graph diffusion + node projection (tanh)   [stand-in for CGRNN]
#   + final 1x1 conv (Dg -> 1) + classifier (V -> 200 -> n_class)
# ----------------------------------------------------------------------------
def _tail_kernel(xm_ref, xf_ref, wq_ref, wk_ref,
                 wg_ref, bg_ref, wfc_ref, bfc_ref,
                 wc1_ref, bc1_ref, wc2_ref, bc2_ref, o_ref):
    B, V, Da = xm_ref.shape
    Dg = wg_ref.shape[1]
    d_model = wq_ref.shape[1]

    # ---- Variable_Attention_layer on the frequency channel (all B at once) ----
    xf = xf_ref[...]                                                   # (B, V, T)
    q = jnp.einsum('bvt,td->bvd', xf, wq_ref[...],
                   preferred_element_type=jnp.float32)                 # (B, V, d)
    k = jnp.einsum('bvt,td->bvd', xf, wk_ref[...],
                   preferred_element_type=jnp.float32)                 # (B, V, d)
    prod = jnp.einsum('bvd,bud->bvu', q, k,
                      preferred_element_type=jnp.float32)              # (B, V, V)
    s = jnp.maximum(prod, 0.0) * (1.0 / float(np.sqrt(d_model)))
    m = jnp.max(s, axis=-1, keepdims=True)
    p = jnp.exp(s - m)
    s_norm = p * pl.reciprocal(jnp.sum(p, axis=-1, keepdims=True), approx=True)

    # ---- adjacency: batch mean + symmetrize + softmax + symmetrize ----
    adj = jnp.mean(s_norm, axis=0)                                     # (V, V)
    adj = 0.5 * (adj + adj.T)
    ma = jnp.max(adj, axis=-1, keepdims=True)
    pa = jnp.exp(adj - ma)
    sm = pa * pl.reciprocal(jnp.sum(pa, axis=-1, keepdims=True), approx=True)
    adj = 0.5 * (sm + sm.T)

    # ---- graph diffusion  h[b] = adj @ xm[b]  (stand-in for CGRNN) ----
    xm = xm_ref[...]                                                   # (B, V, Da)
    adj_b = jnp.broadcast_to(adj[None, :, :], (B, V, V))
    h = jnp.einsum('bvu,bud->bvd', adj_b, xm,
                   preferred_element_type=jnp.float32).reshape(B * V, Da)

    # node projection -> (B*V, Dg)
    g = jnp.tanh(jnp.dot(h, wg_ref[...], preferred_element_type=jnp.float32)
                 + bg_ref[...])

    # final_conv: 1x1 conv Dg -> 1  (lane reduction; avoids a (.,1)->(.,V) reshape)
    g3 = g.reshape(B, V, Dg)
    out = jnp.sum(g3 * wfc_ref[...][None, :, :], axis=-1) + bfc_ref[...]   # (B, V)

    # classifier (d_static == 0): Linear(V,200) -> ReLU -> Linear(200,n_class)
    c1 = jnp.maximum(jnp.dot(out, wc1_ref[...], preferred_element_type=jnp.float32)
                     + bc1_ref[...], 0.0)
    o_ref[...] = (jnp.dot(c1, wc2_ref[...], preferred_element_type=jnp.float32)
                  + bc2_ref[...]).astype(o_ref.dtype)


def fused_tail(x_mean, nufft_f, params):
    B = x_mean.shape[0]
    n_class = params["w_c2"].shape[1]
    return pl.pallas_call(
        _tail_kernel,
        out_shape=jax.ShapeDtypeStruct((B, n_class), jnp.float32),
    )(x_mean, nufft_f, params["WQ_f"], params["WK_f"],
      params["wg"], params["bg"], params["w_fc"], params["b_fc"],
      params["w_c1"], params["b_c1"], params["w_c2"], params["b_c2"])


# ----------------------------------------------------------------------------
# PositionalEncodingTF (cheap sin/cos, plain XLA glue)
# ----------------------------------------------------------------------------
def positional_encoding(p_time, d_model, max_len):
    # p_time: (T, B)  ->  pe: (T, B, d_model)
    num_ts = d_model // 2
    timescales = jnp.asarray(max_len ** np.linspace(0.0, 1.0, num_ts), jnp.float32)
    scaled = p_time[:, :, None] / timescales[None, None, :]
    return jnp.concatenate([jnp.sin(scaled), jnp.cos(scaled)], axis=-1)


# ----------------------------------------------------------------------------
# Parameter init (deterministic, synthetic)
# ----------------------------------------------------------------------------
def init_params(key, V, T, Da, Dg, n_class):
    keys = iter(jax.random.split(key, 32))

    def rn(shape, scale=0.1):
        return scale * jax.random.normal(next(keys), shape, dtype=jnp.float32)

    # packed (10, Da) vector table:
    #   0: w_in[0]  1: w_in[1]  2: b_in  3: bo  4: b1  5: b2
    #   6: gamma1   7: beta1    8: gamma2 9: beta2
    vecs = jnp.concatenate([
        rn((2, Da)),                          # input-projection weights
        jnp.zeros((4, Da), jnp.float32),      # b_in, bo, b1, b2
        jnp.ones((1, Da), jnp.float32),       # gamma1
        jnp.zeros((1, Da), jnp.float32),      # beta1
        jnp.ones((1, Da), jnp.float32),       # gamma2
        jnp.zeros((1, Da), jnp.float32),      # beta2
    ], axis=0)

    tf = {
        "w_qkv": jnp.concatenate([rn((Da, Da)), rn((Da, Da)), rn((Da, Da))], axis=1),
        "b_qkv": jnp.zeros((1, 3 * Da), jnp.float32),
        "w_other": jnp.concatenate([rn((Da, Da)), rn((Da, Da)), rn((Da, Da))], axis=1),
        "vecs": vecs,
    }
    params = {
        "num_of_vertices": V,
        "attention_d_model": Da,
        "graph_node_d_model": Dg,
        "tf": tf,
        # Variable_Attention_layer uses torch.randn (scale 1.0)
        "WQ_f": jax.random.normal(next(keys), (T, T), jnp.float32),
        "WK_f": jax.random.normal(next(keys), (T, T), jnp.float32),
        "wg": rn((Da, Dg)), "bg": jnp.zeros((1, Dg), jnp.float32),
        "w_fc": rn((1, Dg)), "b_fc": jnp.zeros((1, 1), jnp.float32),
        "w_c1": rn((V, 200)), "b_c1": jnp.zeros((1, 200), jnp.float32),
        "w_c2": rn((200, n_class)), "b_c2": jnp.zeros((1, n_class), jnp.float32),
    }
    return params


# ----------------------------------------------------------------------------
# CGU forward (d_static = 0 branch)
# ----------------------------------------------------------------------------
def cgu_forward(params, x, nufft, delta_t, lengths, static=None):
    V = params["num_of_vertices"]
    Da = params["attention_d_model"]
    B, T, _ = x.shape

    value = jnp.transpose(x[:, :, :V], (0, 2, 1))            # (B, V, T)
    obs_mask = jnp.transpose(x[:, :, V:2 * V], (0, 2, 1))    # (B, V, T)
    step = x[:, :, -1]                                       # (B, T)

    # temporal positional encoding (added inside the fused encoder kernel)
    pe_b = jnp.transpose(positional_encoding(step.T, Da, T), (1, 0, 2))   # (B, T, Da)

    # key-padding mask kept at (B, 1, T): no V-fold repeat/materialization
    pad = (jnp.arange(T)[None, :] >= lengths[:, None]).astype(jnp.float32)[:, None, :]

    # column layout so the kernel broadcasts over the D lanes directly
    value_col = value.reshape(B, V * T, 1)
    obs_col = obs_mask.reshape(B, V * T, 1)

    # launch 1: input projection + PE + transformer + x_TAt mix + mean over time
    x_mean = fused_temporal_encoder(value_col, obs_col, pe_b, pad, params["tf"])  # (B,V,Da)

    # launch 2: variable attention over nufft channel 1 + adjacency + graph
    #           diffusion + node projection + final conv + classifier
    nufft_f = jnp.transpose(nufft[:, 1, :, :], (0, 2, 1))                   # (B, V, T)
    # TODO(synk): CGRNN source was not provided; graph diffusion + tanh projection
    # stand-in inside the tail kernel (graph PE / delta_t it would consume unused).
    _ = delta_t
    logits = fused_tail(x_mean, nufft_f, params)                            # (B, n_class)
    return logits


# ----------------------------------------------------------------------------
if __name__ == "__main__":
    B, V, T = 2, 8, 16
    Da, Dg, n_class = 16, 8, 2

    key = jax.random.PRNGKey(0)
    kx, km, kn, kd, kp = jax.random.split(key, 5)

    vals = jax.random.normal(kx, (B, T, V), dtype=jnp.float32)
    obs = (jax.random.uniform(km, (B, T, V)) > 0.5).astype(jnp.float32)
    times = jnp.broadcast_to(jnp.arange(T, dtype=jnp.float32)[None, :], (B, T))
    x = jnp.concatenate([vals, obs, times[:, :, None]], axis=-1)   # (B, T, 2V+1)

    nufft = jax.random.normal(kn, (B, 2, T, V), dtype=jnp.float32)
    delta_t = jnp.abs(jax.random.normal(kd, (B, T), dtype=jnp.float32))
    lengths = jnp.array([T, T - 4], dtype=jnp.int32)

    params = init_params(kp, V, T, Da, Dg, n_class)

    logits = cgu_forward(params, x, nufft, delta_t, lengths)
    logits = jax.block_until_ready(logits)
    assert logits.shape == (B, n_class)
    assert bool(jnp.all(jnp.isfinite(logits)))
    print("KERNEL_OK")
</pallas_src>

<mosaic_0001>
module attributes {stable_mosaic.version = 11 : i64} {
  func.func @_encoder_kernel(%arg0: i32, %arg1: memref<1x128x1xf32, #tpu.memory_space<vmem>>, %arg2: memref<1x128x1xf32, #tpu.memory_space<vmem>>, %arg3: memref<1x16x16xf32, #tpu.memory_space<vmem>>, %arg4: memref<1x1x16xf32, #tpu.memory_space<vmem>>, %arg5: memref<16x48xf32, #tpu.memory_space<vmem>>, %arg6: memref<1x48xf32, #tpu.memory_space<vmem>>, %arg7: memref<16x48xf32, #tpu.memory_space<vmem>>, %arg8: memref<10x16xf32, #tpu.memory_space<vmem>>, %arg9: memref<1x8x16xf32, #tpu.memory_space<vmem>>) attributes {dimension_semantics = [#tpu.dimension_semantics<parallel>], iteration_bounds = array<i64: 2>, scalar_prefetch = 0 : i64, scratch_operands = 0 : i64, tpu.core_type = #tpu.core_type<tc>, window_params = [{transform_indices = @transform_0, window_bounds = array<i64: 1, 128, 1>}, {transform_indices = @transform_1, window_bounds = array<i64: 1, 128, 1>}, {transform_indices = @transform_2, window_bounds = array<i64: 1, 16, 16>}, {transform_indices = @transform_3, window_bounds = array<i64: 1, 1, 16>}, {pipeline_mode = #tpu.pipeline_mode<synchronous>, transform_indices = @transform_4, window_bounds = array<i64: 16, 48>}, {pipeline_mode = #tpu.pipeline_mode<synchronous>, transform_indices = @transform_5, window_bounds = array<i64: 1, 48>}, {pipeline_mode = #tpu.pipeline_mode<synchronous>, transform_indices = @transform_6, window_bounds = array<i64: 16, 48>}, {pipeline_mode = #tpu.pipeline_mode<synchronous>, transform_indices = @transform_7, window_bounds = array<i64: 10, 16>}, {transform_indices = @transform_8, window_bounds = array<i64: 1, 8, 16>}]} {
    %c0 = arith.constant 0 : index
    %c0_0 = arith.constant 0 : index
    %c0_1 = arith.constant 0 : index
    %0 = vector.load %arg1[%c0, %c0_0, %c0_1] : memref<1x128x1xf32, #tpu.memory_space<vmem>>, vector<1x128x1xf32>
    %1 = vector.shape_cast %0 : vector<1x128x1xf32> to vector<128x1xf32>
    %c0_2 = arith.constant 0 : index
    %c0_3 = arith.constant 0 : index
    %c0_4 = arith.constant 0 : index
    %2 = vector.load %arg2[%c0_2, %c0_3, %c0_4] : memref<1x128x1xf32, #tpu.memory_space<vmem>>, vector<1x128x1xf32>
    %3 = vector.shape_cast %2 : vector<1x128x1xf32> to vector<128x1xf32>
    %c0_5 = arith.constant 0 : index
    %c0_6 = arith.constant 0 : index
    %c0_7 = arith.constant 0 : index
    %4 = vector.load %arg3[%c0_5, %c0_6, %c0_7] : memref<1x16x16xf32, #tpu.memory_space<vmem>>, vector<1x16x16xf32>
    %5 = vector.shape_cast %4 : vector<1x16x16xf32> to vector<16x16xf32>
    %c0_8 = arith.constant 0 : index
    %c0_9 = arith.constant 0 : index
    %c0_10 = arith.constant 0 : index
    %6 = vector.load %arg4[%c0_8, %c0_9, %c0_10] : memref<1x1x16xf32, #tpu.memory_space<vmem>>, vector<1x1x16xf32>
    %7 = vector.shape_cast %6 : vector<1x1x16xf32> to vector<1x16xf32>
    %c0_11 = arith.constant 0 : index
    %c0_12 = arith.constant 0 : index
    %8 = vector.load %arg8[%c0_11, %c0_12] : memref<10x16xf32, #tpu.memory_space<vmem>>, vector<10x16xf32>
    %9 = vector.extract_strided_slice %8 {offsets = [0, 0], sizes = [1, 16], strides = [1, 1]} : vector<10x16xf32> to vector<1x16xf32>
    %10 = vector.extract_strided_slice %8 {offsets = [1, 0], sizes = [1, 16], strides = [1, 1]} : vector<10x16xf32> to vector<1x16xf32>
    %11 = vector.extract_strided_slice %8 {offsets = [2, 0], sizes = [1, 16], strides = [1, 1]} : vector<10x16xf32> to vector<1x16xf32>
    %12 = vector.extract_strided_slice %8 {offsets = [3, 0], sizes = [1, 16], strides = [1, 1]} : vector<10x16xf32> to vector<1x16xf32>
    %13 = vector.extract_strided_slice %8 {offsets = [4, 0], sizes = [1, 16], strides = [1, 1]} : vector<10x16xf32> to vector<1x16xf32>
    %14 = vector.extract_strided_slice %8 {offsets = [5, 0], sizes = [1, 16], strides = [1, 1]} : vector<10x16xf32> to vector<1x16xf32>
    %15 = vector.extract_strided_slice %8 {offsets = [6, 0], sizes = [1, 16], strides = [1, 1]} : vector<10x16xf32> to vector<1x16xf32>
    %16 = vector.extract_strided_slice %8 {offsets = [7, 0], sizes = [1, 16], strides = [1, 1]} : vector<10x16xf32> to vector<1x16xf32>
    %17 = vector.extract_strided_slice %8 {offsets = [8, 0], sizes = [1, 16], strides = [1, 1]} : vector<10x16xf32> to vector<1x16xf32>
    %18 = vector.extract_strided_slice %8 {offsets = [9, 0], sizes = [1, 16], strides = [1, 1]} : vector<10x16xf32> to vector<1x16xf32>
    %19 = vector.shape_cast %5 : vector<16x16xf32> to vector<1x16x16xf32>
    %20 = vector.shape_cast %19 : vector<1x16x16xf32> to vector<1x16x16xf32>
    %21 = vector.broadcast %20 : vector<1x16x16xf32> to vector<8x16x16xf32>
    %22 = vector.shape_cast %21 : vector<8x16x16xf32> to vector<128x16xf32>
    %23 = vector.broadcast %1 : vector<128x1xf32> to vector<128x16xf32>
    %24 = vector.broadcast %9 : vector<1x16xf32> to vector<128x16xf32>
    %25 = arith.mulf %23, %24 : vector<128x16xf32>
    %26 = vector.broadcast %3 : vector<128x1xf32> to vector<128x16xf32>
    %27 = vector.broadcast %10 : vector<1x16xf32> to vector<128x16xf32>
    %28 = arith.mulf %26, %27 : vector<128x16xf32>
    %29 = arith.addf %25, %28 : vector<128x16xf32>
    %30 = vector.broadcast %11 : vector<1x16xf32> to vector<128x16xf32>
    %31 = arith.addf %29, %30 : vector<128x16xf32>
    %32 = arith.addf %31, %22 : vector<128x16xf32>
    %c0_13 = arith.constant 0 : index
    %c0_14 = arith.constant 0 : index
    %33 = vector.load %arg5[%c0_13, %c0_14] : memref<16x48xf32, #tpu.memory_space<vmem>>, vector<16x48xf32>
    %cst = arith.constant dense<0.000000e+00> : vector<128x48xf32>
    %34 = tpu.matmul %32, %33, %cst {dimension_numbers = #tpu.dot_dimension_numbers<[1], [0], [0], [1], [0, 0, 1, 1], [], []>} : vector<128x16xf32>, vector<16x48xf32>, vector<128x48xf32> -> vector<128x48xf32>
    %c0_15 = arith.constant 0 : index
    %c0_16 = arith.constant 0 : index
    %35 = vector.load %arg6[%c0_15, %c0_16] : memref<1x48xf32, #tpu.memory_space<vmem>>, vector<1x48xf32>
    %36 = vector.broadcast %35 : vector<1x48xf32> to vector<128x48xf32>
    %37 = arith.addf %34, %36 : vector<128x48xf32>
    %38 = vector.shape_cast %37 : vector<128x48xf32> to vector<8x16x48xf32>
    %39 = vector.extract_strided_slice %38 {offsets = [0, 0, 0], sizes = [8, 16, 16], strides = [1, 1, 1]} : vector<8x16x48xf32> to vector<8x16x16xf32>
    %40 = vector.extract_strided_slice %38 {offsets = [0, 0, 16], sizes = [8, 16, 16], strides = [1, 1, 1]} : vector<8x16x48xf32> to vector<8x16x16xf32>
    %41 = vector.extract_strided_slice %38 {offsets = [0, 0, 32], sizes = [8, 16, 16], strides = [1, 1, 1]} : vector<8x16x48xf32> to vector<8x16x16xf32>
    "tpu.trace_start"() <{level = 10 : i32, message = "vqd,vkd->vqk"}> : () -> ()
    %cst_17 = arith.constant dense<0.000000e+00> : vector<8x16x16xf32>
    %42 = tpu.matmul %39, %40, %cst_17 {dimension_numbers = #tpu.dot_dimension_numbers<[2], [2], [1], [1], [0, 0, 0, 1, 1, 1], [0], [0]>} : vector<8x16x16xf32>, vector<8x16x16xf32>, vector<8x16x16xf32> -> vector<8x16x16xf32>
    "tpu.trace_stop"() : () -> ()
    %cst_18 = arith.constant 2.500000e-01 : f32
    %43 = vector.broadcast %cst_18 : f32 to vector<8x16x16xf32>
    %44 = arith.mulf %42, %43 : vector<8x16x16xf32>
    %45 = vector.shape_cast %7 : vector<1x16xf32> to vector<1x1x16xf32>
    %cst_19 = arith.constant 5.000000e-01 : f32
    %46 = vector.broadcast %cst_19 : f32 to vector<1x1x16xf32>
    %47 = arith.cmpf ogt, %45, %46 : vector<1x1x16xf32>
    %cst_20 = arith.constant -1.000000e+30 : f32
    %48 = vector.shape_cast %47 : vector<1x1x16xi1> to vector<1x1x16xi1>
    %49 = vector.broadcast %48 : vector<1x1x16xi1> to vector<8x16x16xi1>
    %50 = vector.broadcast %cst_20 : f32 to vector<8x16x16xf32>
    %51 = arith.select %49, %50, %44 : vector<8x16x16xi1>, vector<8x16x16xf32>
    %cst_21 = arith.constant dense<0xFF800000> : vector<8x16xf32>
    %52 = vector.multi_reduction <maximumf>, %51, %cst_21 [2] : vector<8x16x16xf32> to vector<8x16xf32>
    %53 = vector.shape_cast %52 : vector<8x16xf32> to vector<8x16x1xf32>
    %54 = vector.broadcast %53 : vector<8x16x1xf32> to vector<8x16x16xf32>
    %55 = arith.subf %51, %54 : vector<8x16x16xf32>
    %56 = math.exp %55 : vector<8x16x16xf32>
    %cst_22 = arith.constant dense<0.000000e+00> : vector<8x16xf32>
    %57 = vector.multi_reduction <add>, %56, %cst_22 [2] : vector<8x16x16xf32> to vector<8x16xf32>
    %58 = vector.shape_cast %57 : vector<8x16xf32> to vector<8x16x1xf32>
    %59 = tpu.reciprocal %58 {approx = true} : vector<8x16x1xf32> -> vector<8x16x1xf32>
    %60 = vector.broadcast %59 : vector<8x16x1xf32> to vector<8x16x16xf32>
    %61 = arith.mulf %56, %60 : vector<8x16x16xf32>
    "tpu.trace_start"() <{level = 10 : i32, message = "vqk,vkd->vqd"}> : () -> ()
    %cst_23 = arith.constant dense<0.000000e+00> : vector<8x16x16xf32>
    %62 = tpu.matmul %61, %41, %cst_23 {dimension_numbers = #tpu.dot_dimension_numbers<[2], [1], [1], [2], [0, 0, 0, 1, 1, 2], [0], [0]>} : vector<8x16x16xf32>, vector<8x16x16xf32>, vector<8x16x16xf32> -> vector<8x16x16xf32>
    "tpu.trace_stop"() : () -> ()
    %63 = vector.shape_cast %62 : vector<8x16x16xf32> to vector<128x16xf32>
    %c0_24 = arith.constant 0 : index
    %c0_25 = arith.constant 0 : index
    %64 = vector.load %arg7[%c0_24, %c0_25] : memref<16x48xf32, #tpu.memory_space<vmem>>, vector<16x16xf32>
    %c0_26 = arith.constant 0 : index
    %c16 = arith.constant 16 : index
    %65 = vector.load %arg7[%c0_26, %c16] : memref<16x48xf32, #tpu.memory_space<vmem>>, vector<16x16xf32>
    %c0_27 = arith.constant 0 : index
    %c32 = arith.constant 32 : index
    %66 = vector.load %arg7[%c0_27, %c32] : memref<16x48xf32, #tpu.memory_space<vmem>>, vector<16x16xf32>
    %cst_28 = arith.constant dense<0.000000e+00> : vector<128x16xf32>
    %67 = tpu.matmul %63, %64, %cst_28 {dimension_numbers = #tpu.dot_dimension_numbers<[1], [0], [0], [1], [0, 0, 1, 1], [], []>} : vector<128x16xf32>, vector<16x16xf32>, vector<128x16xf32> -> vector<128x16xf32>
    %68 = vector.broadcast %12 : vector<1x16xf32> to vector<128x16xf32>
    %69 = arith.addf %67, %68 : vector<128x16xf32>
    %70 = arith.addf %32, %69 : vector<128x16xf32>
    %cst_29 = arith.constant dense<0.000000e+00> : vector<128xf32>
    %71 = vector.multi_reduction <add>, %70, %cst_29 [1] : vector<128x16xf32> to vector<128xf32>
    %72 = vector.shape_cast %71 : vector<128xf32> to vector<128x1xf32>
    %cst_30 = arith.constant 1.600000e+01 : f32
    %73 = vector.broadcast %cst_30 : f32 to vector<128x1xf32>
    %74 = arith.divf %72, %73 : vector<128x1xf32>
    %75 = vector.broadcast %74 : vector<128x1xf32> to vector<128x16xf32>
    %76 = arith.subf %70, %75 : vector<128x16xf32>
    %77 = arith.mulf %76, %76 : vector<128x16xf32>
    %cst_31 = arith.constant dense<0.000000e+00> : vector<128xf32>
    %78 = vector.multi_reduction <add>, %77, %cst_31 [1] : vector<128x16xf32> to vector<128xf32>
    %79 = vector.shape_cast %78 : vector<128xf32> to vector<128x1xf32>
    %cst_32 = arith.constant 1.600000e+01 : f32
    %80 = vector.broadcast %cst_32 : f32 to vector<128x1xf32>
    %81 = arith.divf %79, %80 : vector<128x1xf32>
    %82 = vector.broadcast %74 : vector<128x1xf32> to vector<128x16xf32>
    %83 = arith.subf %70, %82 : vector<128x16xf32>
    %cst_33 = arith.constant 9.99999974E-6 : f32
    %84 = vector.broadcast %cst_33 : f32 to vector<128x1xf32>
    %85 = arith.addf %81, %84 : vector<128x1xf32>
    %86 = math.rsqrt %85 : vector<128x1xf32>
    %87 = vector.broadcast %86 : vector<128x1xf32> to vector<128x16xf32>
    %88 = arith.mulf %83, %87 : vector<128x16xf32>
    %89 = vector.broadcast %15 : vector<1x16xf32> to vector<128x16xf32>
    %90 = arith.mulf %88, %89 : vector<128x16xf32>
    %91 = vector.broadcast %16 : vector<1x16xf32> to vector<128x16xf32>
    %92 = arith.addf %90, %91 : vector<128x16xf32>
    %cst_34 = arith.constant dense<0.000000e+00> : vector<128x16xf32>
    %93 = tpu.matmul %92, %65, %cst_34 {dimension_numbers = #tpu.dot_dimension_numbers<[1], [0], [0], [1], [0, 0, 1, 1], [], []>} : vector<128x16xf32>, vector<16x16xf32>, vector<128x16xf32> -> vector<128x16xf32>
    %94 = vector.broadcast %13 : vector<1x16xf32> to vector<128x16xf32>
    %95 = arith.addf %93, %94 : vector<128x16xf32>
    %cst_35 = arith.constant 0.000000e+00 : f32
    %96 = vector.broadcast %cst_35 : f32 to vector<128x16xf32>
    %97 = arith.maximumf %95, %96 : vector<128x16xf32>
    %cst_36 = arith.constant dense<0.000000e+00> : vector<128x16xf32>
    %98 = tpu.matmul %97, %66, %cst_36 {dimension_numbers = #tpu.dot_dimension_numbers<[1], [0], [0], [1], [0, 0, 1, 1], [], []>} : vector<128x16xf32>, vector<16x16xf32>, vector<128x16xf32> -> vector<128x16xf32>
    %99 = vector.broadcast %14 : vector<1x16xf32> to vector<128x16xf32>
    %100 = arith.addf %98, %99 : vector<128x16xf32>
    %101 = arith.addf %92, %100 : vector<128x16xf32>
    %cst_37 = arith.constant dense<0.000000e+00> : vector<128xf32>
    %102 = vector.multi_reduction <add>, %101, %cst_37 [1] : vector<128x16xf32> to vector<128xf32>
    %103 = vector.shape_cast %102 : vector<128xf32> to vector<128x1xf32>
    %cst_38 = arith.constant 1.600000e+01 : f32
    %104 = vector.broadcast %cst_38 : f32 to vector<128x1xf32>
    %105 = arith.divf %103, %104 : vector<128x1xf32>
    %106 = vector.broadcast %105 : vector<128x1xf32> to vector<128x16xf32>
    %107 = arith.subf %101, %106 : vector<128x16xf32>
    %108 = arith.mulf %107, %107 : vector<128x16xf32>
    %cst_39 = arith.constant dense<0.000000e+00> : vector<128xf32>
    %109 = vector.multi_reduction <add>, %108, %cst_39 [1] : vector<128x16xf32> to vector<128xf32>
    %110 = vector.shape_cast %109 : vector<128xf32> to vector<128x1xf32>
    %cst_40 = arith.constant 1.600000e+01 : f32
    %111 = vector.broadcast %cst_40 : f32 to vector<128x1xf32>
    %112 = arith.divf %110, %111 : vector<128x1xf32>
    %113 = vector.broadcast %105 : vector<128x1xf32> to vector<128x16xf32>
    %114 = arith.subf %101, %113 : vector<128x16xf32>
    %cst_41 = arith.constant 9.99999974E-6 : f32
    %115 = vector.broadcast %cst_41 : f32 to vector<128x1xf32>
    %116 = arith.addf %112, %115 : vector<128x1xf32>
    %117 = math.rsqrt %116 : vector<128x1xf32>
    %118 = vector.broadcast %117 : vector<128x1xf32> to vector<128x16xf32>
    %119 = arith.mulf %114, %118 : vector<128x16xf32>
    %120 = vector.broadcast %17 : vector<1x16xf32> to vector<128x16xf32>
    %121 = arith.mulf %119, %120 : vector<128x16xf32>
    %122 = vector.broadcast %18 : vector<1x16xf32> to vector<128x16xf32>
    %123 = arith.addf %121, %122 : vector<128x16xf32>
    %124 = vector.broadcast %3 : vector<128x1xf32> to vector<128x16xf32>
    %125 = arith.mulf %124, %32 : vector<128x16xf32>
    %cst_42 = arith.constant 1.000000e+00 : f32
    %126 = vector.broadcast %cst_42 : f32 to vector<128x1xf32>
    %127 = arith.subf %126, %3 : vector<128x1xf32>
    %128 = vector.broadcast %127 : vector<128x1xf32> to vector<128x16xf32>
    %129 = arith.mulf %128, %123 : vector<128x16xf32>
    %130 = arith.addf %125, %129 : vector<128x16xf32>
    %131 = vector.shape_cast %130 : vector<128x16xf32> to vector<8x16x16xf32>
    %cst_43 = arith.constant dense<0.000000e+00> : vector<8x16xf32>
    %132 = vector.multi_reduction <add>, %131, %cst_43 [1] : vector<8x16x16xf32> to vector<8x16xf32>
    %cst_44 = arith.constant 1.600000e+01 : f32
    %133 = vector.broadcast %cst_44 : f32 to vector<8x16xf32>
    %134 = arith.divf %132, %133 : vector<8x16xf32>
    %c0_45 = arith.constant 0 : index
    %c0_46 = arith.constant 0 : index
    %c0_47 = arith.constant 0 : index
    %135 = vector.load %arg9[%c0_45, %c0_46, %c0_47] : memref<1x8x16xf32, #tpu.memory_space<vmem>>, vector<1x8x16xf32>
    %136 = vector.shape_cast %135 : vector<1x8x16xf32> to vector<8x16xf32>
    %137 = vector.shape_cast %134 : vector<8x16xf32> to vector<1x8x16xf32>
    tpu.vector_store %arg9[%c0_45, %c0_46, %c0_47], %137 {strides = array<i32>} : memref<1x8x16xf32, #tpu.memory_space<vmem>>, vector<1x8x16xf32>,
    return
  }
  func.func @transform_0(%arg0: i32) -> (i32, i32, i32) {
    %c0_i32 = arith.constant 0 : i32
    %c0_i32_0 = arith.constant 0 : i32
    %c0_i32_1 = arith.constant 0 : i32
    return %arg0, %c0_i32, %c0_i32_0 : i32, i32, i32
  }
  func.func @transform_1(%arg0: i32) -> (i32, i32, i32) {
    %c0_i32 = arith.constant 0 : i32
    %c0_i32_0 = arith.constant 0 : i32
    %c0_i32_1 = arith.constant 0 : i32
    return %arg0, %c0_i32, %c0_i32_0 : i32, i32, i32
  }
  func.func @transform_2(%arg0: i32) -> (i32, i32, i32) {
    %c0_i32 = arith.constant 0 : i32
    %c0_i32_0 = arith.constant 0 : i32
    %c0_i32_1 = arith.constant 0 : i32
    return %arg0, %c0_i32, %c0_i32_0 : i32, i32, i32
  }
  func.func @transform_3(%arg0: i32) -> (i32, i32, i32) {
    %c0_i32 = arith.constant 0 : i32
    %c0_i32_0 = arith.constant 0 : i32
    %c0_i32_1 = arith.constant 0 : i32
    return %arg0, %c0_i32, %c0_i32_0 : i32, i32, i32
  }
  func.func @transform_4(%arg0: i32) -> (i32, i32) {
    %c0_i32 = arith.constant 0 : i32
    %c0_i32_0 = arith.constant 0 : i32
    %c0_i32_1 = arith.constant 0 : i32
    return %c0_i32, %c0_i32_0 : i32, i32
  }
  func.func @transform_5(%arg0: i32) -> (i32, i32) {
    %c0_i32 = arith.constant 0 : i32
    %c0_i32_0 = arith.constant 0 : i32
    %c0_i32_1 = arith.constant 0 : i32
    return %c0_i32, %c0_i32_0 : i32, i32
  }
  func.func @transform_6(%arg0: i32) -> (i32, i32) {
    %c0_i32 = arith.constant 0 : i32
    %c0_i32_0 = arith.constant 0 : i32
    %c0_i32_1 = arith.constant 0 : i32
    return %c0_i32, %c0_i32_0 : i32, i32
  }
  func.func @transform_7(%arg0: i32) -> (i32, i32) {
    %c0_i32 = arith.constant 0 : i32
    %c0_i32_0 = arith.constant 0 : i32
    %c0_i32_1 = arith.constant 0 : i32
    return %c0_i32, %c0_i32_0 : i32, i32
  }
  func.func @transform_8(%arg0: i32) -> (i32, i32, i32) {
    %c0_i32 = arith.constant 0 : i32
    %c0_i32_0 = arith.constant 0 : i32
    %c0_i32_1 = arith.constant 0 : i32
    return %arg0, %c0_i32, %c0_i32_0 : i32, i32, i32
  }
}

</mosaic_0001>

<bundles_post_ra>
// kernel: tpu_custom_call.1
= control target key start
LH: loop header
LB: loop body
LE: loop exit
PB: predicated region body
PF: predicated region fallthrough
CT: control target
= control target key end

     0   :  { %13 = vsyncpa [#allocation3], 0  ;;  %s6446_s0 = inlined_call_operand.vmem [shape: f32[2,128,1], index: 0, kind: input, shape index: {}]   ;;  %s6447_s1 = inlined_call_operand.vmem [shape: f32[2,128,1], index: 1, kind: input, shape index: {}]   ;;  %s6448_s2 = inlined_call_operand.vmem [shape: f32[2,16,16], index: 2, kind: input, shape index: {}]   ;;  %s6449_s3 = inlined_call_operand.vmem [shape: f32[2,1,16], index: 3, kind: input, shape index: {}]   ;;  %s6450_s4 = inlined_call_operand.vmem [shape: f32[16,48], index: 4, kind: input, shape index: {}]   ;;  %s6451_s5 = inlined_call_operand.vmem [shape: f32[1,48], index: 5, kind: input, shape index: {}]   ;;  %s6452_s6 = inlined_call_operand.vmem [shape: f32[16,48], index: 6, kind: input, shape index: {}]   ;;  %s6453_s7 = inlined_call_operand.vmem [shape: f32[10,16], index: 7, kind: input, shape index: {}]   ;;  %s6454_s8 = inlined_call_operand.hbm [shape: f32[2,8,16], index: 8, kind: output, shape index: {}]  }
   0x1   :  { %15 = vsyncpa [#allocation3 + $0x1], 0  ;;  %s4959_s27 = smov 0   ;;  %s4961_s28 = smov 0  }
   0x2   :  { %s4963_s29 = smov 0   ;;  %s4965_s30 = smov 0  }
   0x3 LB: > { %s4980_s9 = sadd.s32 4294967295, %s4908_s30   ;;  %s3979_s10 = sadd.s32 4294967294, %s4908_s30   ;;  %s4908_s30 = sphi %s4965_s30, %s6515_s30   ;;  %s4904_s29 = sphi %s4963_s29, %s6514_s29   ;;  %s4900_s28 = sphi %s4961_s28, %s6513_s28   ;;  %s4896_s27 = sphi %s4959_s27, %s6512_s27  }
   0x4   : > { %s4984_s11 = sadd.s32 1, %s4908_s30   ;;  %s216_s12 = sadd.s32 1, %s4904_s29 }
   0x5   : > { %s213_s13 = ssub.s32 %s4908_s30, %s4984_s11  ;;  %p226_p0 = scmp.ne.s32.totalorder %s4904_s29, %s4900_s28 }
   0x6   : > { %p214_p1 = scmp.eq.s32.totalorder %s213_s13, 0  ;;  %p227_p2 = scmp.eq.s32.totalorder %s4980_s9, 1 }
   0x7   : > { %p232_p3 = scmp.ne.s32.totalorder %s4900_s28, %s4896_s27  ;;  %p233_p4 = scmp.eq.s32.totalorder %s3979_s10, 1 }
   0x8   : > { %s4995_s14 = scalar_select %p214_p1, %s4904_s29, %s216_s12  }
   0x9   : > { %p4997_p5 = por %p227_p2, %p226_p0  ;;  %p5001_p6 = por %p233_p4, %p232_p3 }
   0xa   : > { %p3982_p7 = scmp.ge.s32.totalorder %s4908_s30, 1  ;;  %p293_p8 = scmp.lt.s32.totalorder %s4908_s30, 3 }
   0xc   : > { %p294_p9 = pnand %p3982_p7, %p293_p8 }
   0xe   : > { %297 = sbr.rel (%p294_p9) target bundleno = 2717 (0xa9d), region = 52 }
  0x15   : > { %v475_v0 = vlaneseq  ;;  %p340_p10 = scmp.lt.s32.totalorder %s4980_s9, 1  ;;  %v4910_v1 = vmov 0   ;;  %v5032_v8 = vld [vmem:[%s6453_s7] sm:$0xff]  ;;  %v648_v27 = vld [vmem:[%s6450_s4 + $0x8] sm:$0xff]  ;;  %vm656_vm1 = vcmask 130048   ;;  %s4911_s12 = smov 112  }
  0x16   : > { %4611 = vset.pattern.permute.xlu1 %v4910_v1  ;;  %4610 = vset.pattern.permute.xlu0 %v4910_v1  ;;  %v647_v26 = vld [vmem:[%s6450_s4] sm:$0xff]  ;;  %vm5357_vm2 = vmpackc.low %vm656_vm1, %vm656_vm1  ;;  %vm3857_vm4 = vcmask 1041409   ;;  %vm3859_vm5 = vcmask 1042434   ;;  %vm3861_vm6 = vcmask 1043459   ;;  %vm3863_vm7 = vcmask 1044484  }
  0x17   : > { %v5008_v2 = vshrl.u32 %v475_v0, 7  ;;  %s5011_s17 = scalar_select %p340_p10, %s4980_s9, 1  ;;  %v4470_v28 = vpack.c.bf16 %v648_v27, %v647_v26  ;;  %vm3865_vm8 = vcmask 1045509   ;;  %vm3867_vm9 = vcmask 1046534  }
  0x18   : > { %vm3869_vm10 = vcmask 1047559  }
  0x19   : > { %v2477_v3 = vsub.s32 3, %v5008_v2  ;;  %s4107_s18 = sshll.u32 %s5011_s17, 7  ;;  %v2899_v4 = vsub.s32 6, %v5008_v2  ;;  %v2919_v5 = vsub.s32 7, %v5008_v2  ;;  %v2939_v6 = vsub.s32 4, %v5008_v2  ;;  %s357_s13 = scalar_lea.vmem %s6449_s3, %s5011_s17  ;;  %4471 = vmatprep.subr.bf16.mxu0 %v4470_v28 }
  0x1a   : > { %v3160_v7 = vsub.s32 5, %v5008_v2  ;;  %s5022_s21 = scalar_lea.vmem %s6446_s0, %s4107_s18  ;;  %s5027_s24 = scalar_lea.vmem %s6447_s1, %s4107_s18  ;;  %v392_v12 = vld [vmem:[%s357_s13] sm:$0x1]  ;;  %v5056_v17 = vsub.s32 0, %v5008_v2  ;;  %4473 = vmatpush3.bf16.msra.mxu0 %v4470_v28  ;;  %v6455_v53 = vsub.s32 1, %v5008_v2  ;;  %v613_v55 = vsub.s32 2, %v5008_v2 }
  0x1b   : > { %v5039_v9 = vrot.slane %v5032_v8, %v2477_v3  ;;  %v359_v10 = vld [vmem:[%s5022_s21 + $0x8] sm:$0xff]  ;;  %v358_v11 = vld [vmem:[%s5022_s21] sm:$0xff]  ;;  %v5044_v13 = vrot.slane %v5032_v8, %v2899_v4  ;;  %v5047_v14 = vrot.slane %v5032_v8, %v2919_v5  ;;  %v5050_v15 = vrot.slane %v5032_v8, %v2939_v6  ;;  %v376_v22 = vld [vmem:[%s5027_s24 + $0x10] sm:$0xff]  ;;  %s4109_s23 = sshll.u32 %s5011_s17, 4  ;;  %s4912_s13 = smov 96  }
  0x1c   : > { %v5053_v16 = vrot.slane %v5032_v8, %v3160_v7  ;;  %402 = vperm.xlu1 %4611, %v359_v10   ;;  %vm1578_vm0 = vcmp.gt.f32.partialorder %v392_v12, 0.5  ;;  %397 = vperm.xlu0 %4610, %v358_v11   ;;  %v375_v18 = vld [vmem:[%s5027_s24 + $0x8] sm:$0xff]  ;;  %v374_v20 = vld [vmem:[%s5027_s24] sm:$0xff]  ;;  %v360_v23 = vld [vmem:[%s5022_s21 + $0x10] sm:$0xff]  ;;  %v5102_v56 = vrot.slane %v5032_v8, %v5056_v17  ;;  %v5107_v57 = vrot.slane %v5032_v8, %v6455_v53  ;;  %s354_s26 = scalar_lea.vmem %s6448_s2, %s4109_s23 }
  0x1d   : > { %v5059_v19 = vsel %vm1578_vm0, 1, %v4910_v1  ;;  %v377_v24 = vld [vmem:[%s5027_s24 + $0x18] sm:$0xff]  ;;  %v378_v29 = vld [vmem:[%s5027_s24 + $0x20] sm:$0xff]  ;;  %v379_v31 = vld [vmem:[%s5027_s24 + $0x28] sm:$0xff]  ;;  %v5116_v60 = vrot.slane %v5032_v8, %v613_v55 }
  0x1e   : > { %v361_v25 = vld [vmem:[%s5022_s21 + $0x18] sm:$0xff]  ;;  %v362_v30 = vld [vmem:[%s5022_s21 + $0x20] sm:$0xff]  ;;  %v363_v32 = vld [vmem:[%s5022_s21 + $0x28] sm:$0xff] }
  0x1f   : > { %v380_v33 = vld [vmem:[%s5027_s24 + $0x30] sm:$0xff]  ;;  %v381_v35 = vld [vmem:[%s5027_s24 + $0x38] sm:$0xff]  ;;  %v382_v37 = vld [vmem:[%s5027_s24 + $0x40] sm:$0xff] }
  0x20   : > { %502 = vperm.xlu1 %4611, %v375_v18   ;;  %497 = vperm.xlu0 %4610, %v374_v20   ;;  %v364_v34 = vld [vmem:[%s5022_s21 + $0x30] sm:$0xff]  ;;  %v365_v36 = vld [vmem:[%s5022_s21 + $0x38] sm:$0xff]  ;;  %v366_v38 = vld [vmem:[%s5022_s21 + $0x40] sm:$0xff] }
  0x21   : > { %v383_v39 = vld [vmem:[%s5027_s24 + $0x48] sm:$0xff]  ;;  %v384_v41 = vld [vmem:[%s5027_s24 + $0x50] sm:$0xff]  ;;  %v385_v43 = vld [vmem:[%s5027_s24 + $0x58] sm:$0xff] }
  0x22   : > { %v367_v40 = vld [vmem:[%s5022_s21 + $0x48] sm:$0xff]  ;;  %v368_v42 = vld [vmem:[%s5022_s21 + $0x50] sm:$0xff]  ;;  %v369_v44 = vld [vmem:[%s5022_s21 + $0x58] sm:$0xff] }
  0x23   : > { %v386_v45 = vld [vmem:[%s5027_s24 + $0x60] sm:$0xff]  ;;  %v387_v47 = vld [vmem:[%s5027_s24 + $0x68] sm:$0xff]  ;;  %v388_v49 = vld [vmem:[%s5027_s24 + $0x70] sm:$0xff] }
  0x24   : > { %507 = vperm.xlu1 %4611, %v376_v22   ;;  %407 = vperm.xlu0 %4610, %v360_v23   ;;  %v370_v46 = vld [vmem:[%s5022_s21 + $0x60] sm:$0xff]  ;;  %v371_v48 = vld [vmem:[%s5022_s21 + $0x68] sm:$0xff]  ;;  %v372_v50 = vld [vmem:[%s5022_s21 + $0x70] sm:$0xff] }
  0x25   : > { %v389_v51 = vld [vmem:[%s5027_s24 + $0x78] sm:$0xff]  ;;  %v5126_v4 = vld [vmem:[%s354_s26 + $0x8] sm:$0xff]  ;;  %v5130_v7 = vld [vmem:[%s354_s26] sm:$0xff]  ;;  %s4104_s26 = sshll.u32 %s4980_s9, 7  ;;  %s4913_s9 = smov [#allocation2]  }
  0x26   : > { %v373_v52 = vld [vmem:[%s5022_s21 + $0x78] sm:$0xff]  ;;  %s337_s21 = sand.u32 1, %s4900_s28   ;;  %s6403_s18 = scalar_lea.hbm %s6454_s8, %s4104_s26 }
  0x27   : > { %s3983_s25 = sshll.u32 %s337_s21, 3  ;;  %s3874_s19 = scalar_lea.sflag [#allocation3], %s337_s21 }
  0x28   : > { %512 = vperm.xlu1 %4611, %v377_v24   ;;  %412 = vperm.xlu0 %4610, %v361_v25   ;;  %s339_s17 = scalar_lea.vmem [#allocation2], %s3983_s25  ;;  %s4850_s22 = sshll.u32 %s4913_s9, 4  ;;  %s4851_s22 = int_to_ptr.vmem [resolvable:$false] %s4850_s22 }
  0x29   : > { %s3887_s10 = sshll.u32 %s339_s17, 4  ;;  %s6405_s10 = int_to_ptr.vmem [resolvable:$true] %s3887_s10 }
  0x2a   : > { %s4846_s20 = scalar_lea.vmem %s6405_s10, 128  ;;  %p4853_p0 = scmp.lt.s32.totalorder %s6405_s10, %s4851_s22 }
  0x2b   : > { %p4847_p11 = scmp.ne.s32.totalorder %s6405_s10, %s4846_s20 }
  0x2c   : > { %517 = vperm.xlu1 %4611, %v378_v29   ;;  %417 = vperm.xlu0 %4610, %v362_v30  }
  0x2d   : > { %p4848_p12 = pnand %p4847_p11, %p4997_p5 }
  0x2f   : > { %p4849_p13 = pneg %p4848_p12 }
  0x30   : > { %522 = vperm.xlu1 %4611, %v379_v31   ;;  %422 = vperm.xlu0 %4610, %v363_v32  }
  0x34   : > { %527 = vperm.xlu1 %4611, %v380_v33   ;;  %427 = vperm.xlu0 %4610, %v364_v34  }
  0x38   : > { %532 = vperm.xlu1 %4611, %v381_v35   ;;  %432 = vperm.xlu0 %4610, %v365_v36  }
  0x3c   : > { %537 = vperm.xlu1 %4611, %v382_v37   ;;  %437 = vperm.xlu0 %4610, %v366_v38  }
  0x40   : > { %542 = vperm.xlu1 %4611, %v383_v39   ;;  %442 = vperm.xlu0 %4610, %v367_v40  }
  0x44   : > { %547 = vperm.xlu1 %4611, %v384_v41   ;;  %447 = vperm.xlu0 %4610, %v368_v42  }
  0x48   : > { %552 = vperm.xlu1 %4611, %v385_v43   ;;  %452 = vperm.xlu0 %4610, %v369_v44  }
  0x4c   : > { %557 = vperm.xlu1 %4611, %v386_v45   ;;  %457 = vperm.xlu0 %4610, %v370_v46  }
  0x50   : > { %562 = vperm.xlu1 %4611, %v387_v47   ;;  %462 = vperm.xlu0 %4610, %v371_v48  }
  0x54   : > { %567 = vperm.xlu1 %4611, %v388_v49   ;;  %467 = vperm.xlu0 %4610, %v372_v50  }
  0x58   : > { %572 = vperm.xlu1 %4611, %v389_v51   ;;  %472 = vperm.xlu0 %4610, %v373_v52  }
  0x9b   : > { %v403_v54 = vpop.permute.xlu1 %402  ;;  %v398_v58 = vpop.permute.xlu0 %397 }
  0x9c   : > { %v480_v61 = vmul.f32 %v5102_v56, %v403_v54  ;;  %v479_v0 = vmul.f32 %v5102_v56, %v398_v58 }
  0x9f   : > { %v5110_v59 = vpop.permute.xlu1 %502  ;;  %v5121_v63 = vpop.permute.xlu0 %497 }
  0xa0   : > { %v580_v62 = vmul.f32 %v5107_v57, %v5110_v59  ;;  %v579_v1 = vmul.f32 %v5107_v57, %v5121_v63 }
  0xa2   : > { %v596_v3 = vadd.f32 %v580_v62, %v480_v61  ;;  %v595_v5 = vadd.f32 %v579_v1, %v479_v0 }
  0xa3   : > { %v5128_v6 = vpop.permute.xlu1 %507  ;;  %v408_v11 = vpop.permute.xlu0 %407 }
  0xa4   : > { %v616_v8 = vadd.f32 %v5116_v60, %v596_v3  ;;  %v581_v10 = vmul.f32 %v5107_v57, %v5128_v6  ;;  %v615_v12 = vadd.f32 %v5116_v60, %v595_v5  ;;  %v481_v18 = vmul.f32 %v5102_v56, %v408_v11 }
  0xa6   : > { %v5138_v20 = vadd.f32 %v616_v8, %v5126_v4  ;;  %v5141_v22 = vadd.f32 %v615_v12, %v5130_v7  ;;  %v597_v23 = vadd.f32 %v581_v10, %v481_v18 }
  0xa7   : > { %v5143_v24 = vpop.permute.xlu1 %512  ;;  %v413_v26 = vpop.permute.xlu0 %412 }
  0xa8   : > { %v582_v25 = vmul.f32 %v5107_v57, %v5143_v24  ;;  %v617_v27 = vadd.f32 %v5116_v60, %v597_v23  ;;  %v482_v28 = vmul.f32 %v5102_v56, %v413_v26  ;;  %4250 = vmatprep.mubr.msk.f32.mxu0 %vm656_vm1, %v5141_v22 }
  0xa9   : > { %4251 = vmatmul.mubr.msk.f32.vlgmr.msra.gmra.mrb[0].mxu0 %vm656_vm1, %v5138_v20 }
  0xaa   : > { %v598_v29 = vadd.f32 %v582_v25, %v482_v28  ;;  %v5156_v31 = vadd.f32 %v617_v27, %v5130_v7 }
  0xab   : > { %v5153_v30 = vpop.permute.xlu1 %517  ;;  %v418_v33 = vpop.permute.xlu0 %417 }
  0xac   : > { %v583_v32 = vmul.f32 %v5107_v57, %v5153_v30  ;;  %v618_v34 = vadd.f32 %v5116_v60, %v598_v29  ;;  %v483_v35 = vmul.f32 %v5102_v56, %v418_v33  ;;  %4253 = vmatprep.mubr.msk.f32.mxu0 %vm656_vm1, %v5156_v31 }
  0xae   : > { %v599_v36 = vadd.f32 %v583_v32, %v483_v35  ;;  %v5167_v38 = vadd.f32 %v618_v34, %v5126_v4 }
  0xaf   : > { %v5164_v37 = vpop.permute.xlu1 %522  ;;  %v423_v40 = vpop.permute.xlu0 %422 }
  0xb0   : > { %6474 = vst [vmem:[#allocation5_spill] sm:$0xff] %v5164_v37  ;;  %v584_v39 = vmul.f32 %v5107_v57, %v5164_v37  ;;  %v619_v41 = vadd.f32 %v5116_v60, %v599_v36  ;;  %v484_v42 = vmul.f32 %v5102_v56, %v423_v40  ;;  %4254 = vmatmul.mubr.msk.f32.gmra.mrb[2].mxu0 %vm656_vm1, %v5167_v38 }
  0xb2   : > { %v600_v43 = vadd.f32 %v584_v39, %v484_v42  ;;  %v5178_v45 = vadd.f32 %v619_v41, %v5130_v7 }
  0xb3   : > { %v5175_v44 = vpop.permute.xlu1 %527  ;;  %v428_v47 = vpop.permute.xlu0 %427 }
  0xb4   : > { %6475 = vst [vmem:[#allocation6_spill] sm:$0xff] %v5175_v44  ;;  %v585_v46 = vmul.f32 %v5107_v57, %v5175_v44  ;;  %v620_v48 = vadd.f32 %v5116_v60, %v600_v43  ;;  %v485_v49 = vmul.f32 %v5102_v56, %v428_v47  ;;  %4256 = vmatprep.mubr.msk.f32.mxu0 %vm656_vm1, %v5178_v45 }
  0xb6   : > { %v601_v50 = vadd.f32 %v585_v46, %v485_v49  ;;  %v5189_v52 = vadd.f32 %v620_v48, %v5126_v4 }
  0xb7   : > { %v5186_v51 = vpop.permute.xlu1 %532  ;;  %v433_v55 = vpop.permute.xlu0 %432 }
  0xb8   : > { %6476 = vst [vmem:[#allocation7_spill] sm:$0xff] %v5186_v51  ;;  %v586_v54 = vmul.f32 %v5107_v57, %v5186_v51  ;;  %v621_v58 = vadd.f32 %v5116_v60, %v601_v50  ;;  %v486_v61 = vmul.f32 %v5102_v56, %v433_v55  ;;  %4257 = vmatmul.mubr.msk.f32.gmra.mrb[4].mxu0 %vm656_vm1, %v5189_v52 }
  0xba   : > { %v602_v62 = vadd.f32 %v586_v54, %v486_v61  ;;  %v5200_v1 = vadd.f32 %v621_v58, %v5130_v7 }
  0xbb   : > { %v5197_v0 = vpop.permute.xlu1 %537  ;;  %v438_v5 = vpop.permute.xlu0 %437 }
  0xbc   : > { %6477 = vst [vmem:[#allocation8_spill] sm:$0xff] %v5197_v0  ;;  %v587_v3 = vmul.f32 %v5107_v57, %v5197_v0  ;;  %v622_v8 = vadd.f32 %v5116_v60, %v602_v62  ;;  %v487_v10 = vmul.f32 %v5102_v56, %v438_v5  ;;  %4259 = vmatprep.mubr.msk.f32.mxu0 %vm656_vm1, %v5200_v1 }
  0xbe   : > { %v603_v11 = vadd.f32 %v587_v3, %v487_v10  ;;  %v5211_v18 = vadd.f32 %v622_v8, %v5126_v4 }
  0xbf   : > { %v5208_v12 = vpop.permute.xlu1 %542  ;;  %v443_v25 = vpop.permute.xlu0 %442 }
  0xc0   : > { %6478 = vst [vmem:[#allocation9_spill] sm:$0xff] %v5208_v12  ;;  %v588_v23 = vmul.f32 %v5107_v57, %v5208_v12  ;;  %v623_v26 = vadd.f32 %v5116_v60, %v603_v11  ;;  %v488_v27 = vmul.f32 %v5102_v56, %v443_v25  ;;  %4260 = vmatmul.mubr.msk.f32.gmra.mrb[6].mxu0 %vm656_vm1, %v5211_v18 }
  0xc2   : > { %v604_v28 = vadd.f32 %v588_v23, %v488_v27  ;;  %v5222_v32 = vadd.f32 %v623_v26, %v5130_v7 }
  0xc3   : > { %v5219_v29 = vpop.permute.xlu1 %547  ;;  %v448_v34 = vpop.permute.xlu0 %447 }
  0xc4   : > { %6479 = vst [vmem:[#allocation10_spill] sm:$0xff] %v5219_v29  ;;  %v589_v33 = vmul.f32 %v5107_v57, %v5219_v29  ;;  %v624_v35 = vadd.f32 %v5116_v60, %v604_v28  ;;  %v489_v36 = vmul.f32 %v5102_v56, %v448_v34  ;;  %4262 = vmatprep.mubr.msk.f32.mxu0 %vm656_vm1, %v5222_v32 }
  0xc6   : > { %v605_v39 = vadd.f32 %v589_v33, %v489_v36  ;;  %v5233_v41 = vadd.f32 %v624_v35, %v5126_v4 }
  0xc7   : > { %v5230_v40 = vpop.permute.xlu1 %552  ;;  %v453_v43 = vpop.permute.xlu0 %452 }
  0xc8   : > { %6480 = vst [vmem:[#allocation11_spill] sm:$0xff] %v5230_v40  ;;  %v590_v42 = vmul.f32 %v5107_v57, %v5230_v40  ;;  %v625_v46 = vadd.f32 %v5116_v60, %v605_v39  ;;  %v490_v47 = vmul.f32 %v5102_v56, %v453_v43  ;;  %4263 = vmatmul.mubr.msk.f32.gmra.mrb[8].mxu0 %vm656_vm1, %v5233_v41 }
  0xca   : > { %v606_v48 = vadd.f32 %v590_v42, %v490_v47  ;;  %v5244_v50 = vadd.f32 %v625_v46, %v5130_v7 }
  0xcb   : > { %v5241_v49 = vpop.permute.xlu1 %557  ;;  %v458_v55 = vpop.permute.xlu0 %457 }
  0xcc   : > { %6481 = vst [vmem:[#allocation12_spill] sm:$0xff] %v5241_v49  ;;  %v591_v54 = vmul.f32 %v5107_v57, %v5241_v49  ;;  %v626_v58 = vadd.f32 %v5116_v60, %v606_v48  ;;  %v491_v61 = vmul.f32 %v5102_v56, %v458_v55  ;;  %4265 = vmatprep.mubr.msk.f32.mxu0 %vm656_vm1, %v5244_v50 }
  0xce   : > { %v607_v62 = vadd.f32 %v591_v54, %v491_v61  ;;  %v5255_v5 = vadd.f32 %v626_v58, %v5126_v4 }
  0xcf   : > { %v5252_v3 = vpop.permute.xlu1 %562  ;;  %v463_v10 = vpop.permute.xlu0 %462 }
  0xd0   : > { %6482 = vst [vmem:[#allocation13_spill] sm:$0xff] %v5252_v3  ;;  %6483 = vst [vmem:[#allocation14_spill] sm:$0xff] %v5255_v5  ;;  %v592_v8 = vmul.f32 %v5107_v57, %v5252_v3  ;;  %v627_v11 = vadd.f32 %v5116_v60, %v607_v62  ;;  %v492_v23 = vmul.f32 %v5102_v56, %v463_v10  ;;  %4266 = vmatmul.mubr.msk.f32.gmra.mrb[10].mxu0 %vm656_vm1, %v5255_v5 }
  0xd2   : > { %v608_v25 = vadd.f32 %v592_v8, %v492_v23  ;;  %v5266_v27 = vadd.f32 %v627_v11, %v5130_v7 }
  0xd3   : > { %v5263_v26 = vpop.permute.xlu1 %567  ;;  %v468_v33 = vpop.permute.xlu0 %467 }
  0xd4   : > { %6484 = vst [vmem:[#allocation15_spill] sm:$0xff] %v5263_v26  ;;  %6485 = vst [vmem:[#allocation16_spill] sm:$0xff] %v5266_v27  ;;  %v593_v28 = vmul.f32 %v5107_v57, %v5263_v26  ;;  %v628_v34 = vadd.f32 %v5116_v60, %v608_v25  ;;  %v493_v35 = vmul.f32 %v5102_v56, %v468_v33  ;;  %4268 = vmatprep.mubr.msk.f32.mxu0 %vm656_vm1, %v5266_v27 }
  0xd6   : > { %v609_v36 = vadd.f32 %v593_v28, %v493_v35  ;;  %v5277_v42 = vadd.f32 %v628_v34, %v5126_v4 }
  0xd7   : > { %v5274_v39 = vpop.permute.xlu1 %572  ;;  %v473_v46 = vpop.permute.xlu0 %472 }
  0xd8   : > { %6486 = vst [vmem:[#allocation17_spill] sm:$0xff] %v5274_v39  ;;  %6487 = vst [vmem:[#allocation18_spill] sm:$0xff] %v5277_v42  ;;  %v594_v43 = vmul.f32 %v5107_v57, %v5274_v39  ;;  %v629_v47 = vadd.f32 %v5116_v60, %v609_v36  ;;  %v494_v48 = vmul.f32 %v5102_v56, %v473_v46  ;;  %4269 = vmatmul.mubr.msk.f32.gmra.mrb[12].mxu0 %vm656_vm1, %v5277_v42  ;;  %v3990_v56 = vld [vmem:[%s6451_s5] ss:$0 sm:$0xff] }
  0xda   : > { %v610_v54 = vadd.f32 %v594_v43, %v494_v48  ;;  %v5286_v55 = vadd.f32 %v629_v47, %v5130_v7 }
  0xdc   : > { %6488 = vst [vmem:[#allocation19_spill] sm:$0xff] %v5286_v55  ;;  %v630_v58 = vadd.f32 %v5116_v60, %v610_v54  ;;  %4271 = vmatprep.mubr.msk.f32.mxu0 %vm656_vm1, %v5286_v55 }
  0xde   : > { %v5292_v61 = vadd.f32 %v630_v58, %v5126_v4 }
  0xe0   : > { %6489 = vst [vmem:[#allocation20_spill] sm:$0xff] %v5292_v61  ;;  %4272 = vmatmul.mubr.msk.f32.gmra.mrb[14].mxu0 %vm656_vm1, %v5292_v61 }
 0x17c   : > { %v4252_v57 = vpop.f32.mrb[0].mxu0 }
 0x17d   : > { %v5299_v62 = vadd.f32 %v4252_v57, %v3990_v56  ;;  %v771_v7 = vpop.f32.mrb[1].mxu0 }
 0x17e   : > { %v772_v8 = vadd.f32 %v3990_v56, %v771_v7 }
 0x180   : > { %4278 = vmatprep.mubr.msk.f32.mxu1 %vm656_vm1, %v772_v8  ;;  %v4612_v60 = vpack.i.bf16 %v5299_v62, %v772_v8 }
 0x182   : > { %4613 = vrot.lane.b32.xlu0 %v4612_v60, %s4911_s12 }
 0x183   : > { %v4255_v4 = vpop.f32.mrb[2].mxu0 }
 0x184   : > { %v5304_v10 = vadd.f32 %v4255_v4, %v3990_v56  ;;  %v781_v11 = vpop.f32.mrb[3].mxu0 }
 0x185   : > { %v782_v23 = vadd.f32 %v3990_v56, %v781_v11 }
 0x187   : > { %v5307_v25 = vpack.i.bf16 %v5304_v10, %v782_v23 }
 0x189   : > { %4618 = vrot.lane.b32.xlu1 %v5307_v25, %s4911_s12 }
 0x18b   : > { %v4258_v28 = vpop.f32.mrb[4].mxu0 }
 0x18c   : > { %v5311_v33 = vadd.f32 %v4258_v28, %v3990_v56  ;;  %v791_v34 = vpop.f32.mrb[5].mxu0 }
 0x18d   : > { %v792_v35 = vadd.f32 %v3990_v56, %v791_v34 }
 0x18f   : > { %v5314_v36 = vpack.i.bf16 %v5311_v33, %v792_v35 }
 0x191   : > { %4623 = vrot.lane.b32.xlu0 %v5314_v36, %s4911_s12 }
 0x193   : > { %v4261_v43 = vpop.f32.mrb[6].mxu0 }
 0x194   : > { %v5318_v46 = vadd.f32 %v4261_v43, %v3990_v56  ;;  %v801_v47 = vpop.f32.mrb[7].mxu0 }
 0x195   : > { %v802_v48 = vadd.f32 %v3990_v56, %v801_v47 }
 0x197   : > { %v5321_v54 = vpack.i.bf16 %v5318_v46, %v802_v48 }
 0x199   : > { %4628 = vrot.lane.b32.xlu1 %v5321_v54, %s4911_s12 }
 0x19b   : > { %v4264_v58 = vpop.f32.mrb[8].mxu0 }
 0x19c   : > { %v5325_v57 = vadd.f32 %v4264_v58, %v3990_v56  ;;  %v811_v7 = vpop.f32.mrb[9].mxu0 }
 0x19d   : > { %v812_v8 = vadd.f32 %v3990_v56, %v811_v7 }
 0x19f   : > { %4306 = vmatprep.mubr.msk.f32.mxu0 %vm656_vm1, %v812_v8  ;;  %v5329_v4 = vpack.i.bf16 %v5325_v57, %v812_v8 }
 0x1a1   : > { %4633 = vrot.lane.b32.xlu0 %v5329_v4, %s4911_s12 }
 0x1a3   : > { %v4267_v11 = vpop.f32.mrb[10].mxu0 }
 0x1a4   : > { %v5333_v28 = vadd.f32 %v4267_v11, %v3990_v56  ;;  %v821_v34 = vpop.f32.mrb[11].mxu0 }
 0x1a5   : > { %v822_v43 = vadd.f32 %v3990_v56, %v821_v34 }
 0x1a7   : > { %v5336_v47 = vpack.i.bf16 %v5333_v28, %v822_v43 }
 0x1a9   : > { %4638 = vrot.lane.b32.xlu1 %v5336_v47, %s4911_s12 }
 0x1ab   : > { %v4270_v58 = vpop.f32.mrb[12].mxu0 }
 0x1ac   : > { %v5340_v7 = vadd.f32 %v4270_v58, %v3990_v56  ;;  %v831_v53 = vpop.f32.mrb[13].mxu0 }
 0x1ad   : > { %v832_v8 = vadd.f32 %v3990_v56, %v831_v53 }
 0x1af   : > { %v5343_v21 = vpack.i.bf16 %v5340_v7, %v832_v8 }
 0x1b1   : > { %4643 = vrot.lane.b32.xlu0 %v5343_v21, %s4911_s12 }
 0x1b3   : > { %v4273_v11 = vpop.f32.mrb[14].mxu0 }
 0x1b4   : > { %v5347_v26 = vadd.f32 %v4273_v11, %v3990_v56  ;;  %v841_v34 = vpop.f32.mrb[15].mxu0 }
 0x1b5   : > { %v842_v39 = vadd.f32 %v3990_v56, %v841_v34 }
 0x1b7   : > { %v5350_v49 = vpack.i.bf16 %v5347_v26, %v842_v39 }
 0x1b9   : > { %4648 = vrot.lane.b32.xlu1 %v5350_v49, %s4911_s12 }
 0x1bd   : > { %4653 = vrot.lane.b32.xlu1 %v4612_v60, %s4912_s13 }
 0x1f4   : > { %v4614_v53 = vpop.permute.xlu0 %4613 }
 0x1f5   : > { %v4616_v58 = vunpack.i.h.bf16 %v4614_v53  ;;  %v4615_v3 = vunpack.i.l.bf16 %v4614_v53 }
 0x1f7   : > { %v4474_v11 = vpack.c.bf16 %v4616_v58, %v4615_v3 }
 0x1f9   : > { %4476 = vmatprep.subr.msk.bf16.mxu1 %vm5357_vm2, %v4474_v11 }
 0x1fa   : > { %4479 = vmatpush3.bf16.xpose.msk.msra.mxu1 %vm5357_vm2, %v4474_v11 }
 0x1fb   : > { %v4619_v56 = vpop.permute.xlu1 %4618 }
 0x1fc   : > { %v4621_v34 = vunpack.i.h.bf16 %v4619_v56  ;;  %v4620_v29 = vunpack.i.l.bf16 %v4619_v56 }
 0x1fe   : > { %v4480_v60 = vpack.c.bf16 %v4621_v34, %v4620_v29 }
 0x200   : > { %4482 = vmatprep.subr.msk.bf16.mxu1 %vm5357_vm2, %v4480_v60 }
 0x201   : > { %4279 = vmatmul.mubr.msk.f32.vlgmr.msra.gmra.mrb[0].mxu1 %vm656_vm1, %v5299_v62 }
 0x202   : > { %4485 = vmatpush3.bf16.xpose.msk.msra.mxu1 %vm5357_vm2, %v4480_v60  ;;  %4285 = vmatprep.mubr.msk.f32.mxu1 %vm656_vm1, %v782_v23 }
 0x203   : > { %v4624_v3 = vpop.permute.xlu0 %4623 }
 0x204   : > { %v4626_v53 = vunpack.i.h.bf16 %v4624_v3  ;;  %v4625_v58 = vunpack.i.l.bf16 %v4624_v3 }
 0x206   : > { %v4486_v12 = vpack.c.bf16 %v4626_v53, %v4625_v58 }
 0x208   : > { %4488 = vmatprep.subr.msk.bf16.mxu1 %vm5357_vm2, %v4486_v12 }
 0x209   : > { %4286 = vmatmul.mubr.msk.f32.vlgmr.msra.gmra.mrb[2].mxu1 %vm656_vm1, %v5304_v10 }
 0x20a   : > { %4491 = vmatpush3.bf16.xpose.msk.msra.mxu1 %vm5357_vm2, %v4486_v12  ;;  %4292 = vmatprep.mubr.msk.f32.mxu1 %vm656_vm1, %v792_v35 }
 0x20b   : > { %v4629_v29 = vpop.permute.xlu1 %4628 }
 0x20c   : > { %v4631_v62 = vunpack.i.h.bf16 %v4629_v29  ;;  %v4630_v11 = vunpack.i.l.bf16 %v4629_v29 }
 0x20e   : > { %v4492_v56 = vpack.c.bf16 %v4631_v62, %v4630_v11 }
 0x210   : > { %4494 = vmatprep.subr.msk.bf16.mxu1 %vm5357_vm2, %v4492_v56 }
 0x211   : > { %4293 = vmatmul.mubr.msk.f32.vlgmr.msra.gmra.mrb[4].mxu1 %vm656_vm1, %v5311_v33 }
 0x212   : > { %4497 = vmatpush3.bf16.xpose.msk.msra.mxu1 %vm5357_vm2, %v4492_v56  ;;  %4299 = vmatprep.mubr.msk.f32.mxu1 %vm656_vm1, %v802_v48 }
 0x213   : > { %v4634_v10 = vpop.permute.xlu0 %4633 }
 0x214   : > { %v4636_v23 = vunpack.i.h.bf16 %v4634_v10  ;;  %v4635_v12 = vunpack.i.l.bf16 %v4634_v10 }
 0x216   : > { %v4498_v34 = vpack.c.bf16 %v4636_v23, %v4635_v12 }
 0x218   : > { %4500 = vmatprep.subr.msk.bf16.mxu0 %vm5357_vm2, %v4498_v34 }
 0x219   : > { %4300 = vmatmul.mubr.msk.f32.vlgmr.msra.gmra.mrb[6].mxu1 %vm656_vm1, %v5318_v46  ;;  %4503 = vmatpush3.bf16.xpose.msk.msra.mxu0 %vm5357_vm2, %v4498_v34 }
 0x21a   : > { %4313 = vmatprep.mubr.msk.f32.mxu1 %vm656_vm1, %v822_v43 }
 0x21b   : > { %v4639_v33 = vpop.permute.xlu1 %4638 }
 0x21c   : > { %v4641_v35 = vunpack.i.h.bf16 %v4639_v33  ;;  %v4640_v60 = vunpack.i.l.bf16 %v4639_v33 }
 0x21e   : > { %v4504_v3 = vpack.c.bf16 %v4641_v35, %v4640_v60 }
 0x220   : > { %4307 = vmatmul.mubr.msk.f32.vlgmr.msra.gmra.mrb[16].mxu0 %vm656_vm1, %v5325_v57  ;;  %4506 = vmatprep.subr.msk.bf16.mxu1 %vm5357_vm2, %v4504_v3 }
 0x221   : > { %4509 = vmatpush3.bf16.xpose.msk.msra.mxu1 %vm5357_vm2, %v4504_v3  ;;  %4320 = vmatprep.mubr.msk.f32.mxu0 %vm656_vm1, %v832_v8 }
 0x223   : > { %v4644_v46 = vpop.permute.xlu0 %4643 }
 0x224   : > { %v4646_v48 = vunpack.i.h.bf16 %v4644_v46  ;;  %v4645_v53 = vunpack.i.l.bf16 %v4644_v46 }
 0x226   : > { %v4510_v58 = vpack.c.bf16 %v4646_v48, %v4645_v53 }
 0x228   : > { %4314 = vmatmul.mubr.msk.f32.vlgmr.msra.gmra.mrb[8].mxu1 %vm656_vm1, %v5333_v28  ;;  %4512 = vmatprep.subr.msk.bf16.mxu0 %vm5357_vm2, %v4510_v58 }
 0x229   : > { %4515 = vmatpush3.bf16.xpose.msk.msra.mxu0 %vm5357_vm2, %v4510_v58  ;;  %4327 = vmatprep.mubr.msk.f32.mxu1 %vm656_vm1, %v842_v39  ;;  %v6492_v39 = vrot.slane %v5059_v19, %v5056_v17 }
 0x22b   : > { %v4649_v57 = vpop.permute.xlu1 %4648  ;;  %vm5418_vm3 = vcmp.eq.s32.totalorder %v6492_v39, 1 }
 0x22c   : > { %v4651_v43 = vunpack.i.h.bf16 %v4649_v57  ;;  %v4650_v29 = vunpack.i.l.bf16 %v4649_v57 }
 0x22e   : > { %v4516_v62 = vpack.c.bf16 %v4651_v43, %v4650_v29 }
 0x22f   : > { %v4654_v8 = vpop.permute.xlu1 %4653 }
 0x230   : > { %v4656_v11 = vunpack.i.h.bf16 %v4654_v8  ;;  %v4655_v56 = vunpack.i.l.bf16 %v4654_v8  ;;  %4321 = vmatmul.mubr.msk.f32.vlgmr.msra.gmra.mrb[18].mxu0 %vm656_vm1, %v5340_v7  ;;  %4518 = vmatprep.subr.msk.bf16.mxu1 %vm5357_vm2, %v4516_v62 }
 0x231   : > { %4521 = vmatpush3.bf16.xpose.msk.msra.mxu1 %vm5357_vm2, %v4516_v62 }
 0x232   : > { %v4522_v28 = vpack.c.bf16 %v4656_v11, %v4655_v56 }
 0x234   : > { %4523 = vmatprep.subr.bf16.mxu0 %v4522_v28 }
 0x235   : > { %4525 = vmatpush3.bf16.msra.mxu0 %v4522_v28 }
 0x238   : > { %4328 = vmatmul.mubr.msk.f32.vlgmr.msra.gmra.mrb[10].mxu1 %vm656_vm1, %v5347_v26 }
 0x2d4   : > { %v4280_v7 = vpop.f32.mrb[0].mxu1 }
 0x2d5   : > { %v1563_v23 = vmul.f32 0.25, %v4280_v7  ;;  %v930_v12 = vpop.f32.mrb[1].mxu1 }
 0x2d6   : > { %v1562_v34 = vmul.f32 0.25, %v930_v12 }
 0x2d7   : > { %v5424_v40 = vsel %vm5418_vm3, -1e+30, %v1563_v23 }
 0x2d8   : > { %v1604_v33 = vsel %vm656_vm1, %v5424_v40, -inf  ;;  %v5430_v26 = vsel %vm5418_vm3, -1e+30, %v1562_v34 }
 0x2d9   : > { %1605 = vmax.xlane.f32.xlu1 %v1604_v33  ;;  %v1601_v19 = vsel %vm656_vm1, %v5430_v26, -inf }
 0x2da   : > { %1602 = vmax.xlane.f32.xlu0 %v1601_v19 }
 0x2dc   : > { %v4287_v35 = vpop.f32.mrb[2].mxu1 }
 0x2dd   : > { %v1565_v60 = vmul.f32 0.25, %v4287_v35  ;;  %v1019_v3 = vpop.f32.mrb[3].mxu1 }
 0x2de   : > { %v1564_v46 = vmul.f32 0.25, %v1019_v3 }
 0x2df   : > { %v5436_v48 = vsel %vm5418_vm3, -1e+30, %v1565_v60 }
 0x2e0   : > { %v1610_v53 = vsel %vm656_vm1, %v5436_v48, -inf  ;;  %v5442_v58 = vsel %vm5418_vm3, -1e+30, %v1564_v46 }
 0x2e1   : > { %1611 = vmax.xlane.f32.xlu0 %v1610_v53  ;;  %v1607_v43 = vsel %vm656_vm1, %v5442_v58, -inf }
 0x2e4   : > { %v4294_v57 = vpop.f32.mrb[4].mxu1 }
 0x2e5   : > { %v1567_v29 = vmul.f32 0.25, %v4294_v57  ;;  %1608 = vmax.xlane.f32.xlu0 %v1607_v43  ;;  %v1108_v62 = vpop.f32.mrb[5].mxu1 }
 0x2e6   : > { %v1566_v8 = vmul.f32 0.25, %v1108_v62 }
 0x2e7   : > { %v5448_v11 = vsel %vm5418_vm3, -1e+30, %v1567_v29 }
 0x2e8   : > { %v1616_v56 = vsel %vm656_vm1, %v5448_v11, -inf  ;;  %v5454_v28 = vsel %vm5418_vm3, -1e+30, %v1566_v8 }
 0x2e9   : > { %1617 = vmax.xlane.f32.xlu0 %v1616_v56  ;;  %v1613_v39 = vsel %vm656_vm1, %v5454_v28, -inf }
 0x2ea   : > { %1614 = vmax.xlane.f32.xlu1 %v1613_v39 }
 0x2ec   : > { %v4301_v7 = vpop.f32.mrb[6].mxu1 }
 0x2ed   : > { %v1569_v23 = vmul.f32 0.25, %v4301_v7  ;;  %v1197_v12 = vpop.f32.mrb[7].mxu1 }
 0x2ee   : > { %v1568_v34 = vmul.f32 0.25, %v1197_v12 }
 0x2ef   : > { %v5460_v33 = vsel %vm5418_vm3, -1e+30, %v1569_v23 }
 0x2f0   : > { %v5464_v19 = vsel %vm5418_vm3, -1e+30, %v1568_v34  ;;  %v1622_v8 = vsel %vm656_vm1, %v5460_v33, -inf }
 0x2f1   : > { %v1619_v7 = vsel %vm656_vm1, %v5464_v19, -inf }
 0x2f3   : > { %v4308_v35 = vpop.f32.mrb[16].mxu0 }
 0x2f4   : > { %v1571_v60 = vmul.f32 0.25, %v4308_v35  ;;  %v1286_v3 = vpop.f32.mrb[17].mxu0 }
 0x2f5   : > { %v1570_v46 = vmul.f32 0.25, %v1286_v3 }
 0x2f6   : > { %v5468_v53 = vsel %vm5418_vm3, -1e+30, %v1571_v60 }
 0x2f7   : > { %v1628_v57 = vsel %vm656_vm1, %v5468_v53, -inf  ;;  %v5474_v43 = vsel %vm5418_vm3, -1e+30, %v1570_v46 }
 0x2f8   : > { %1629 = vmax.xlane.f32.xlu0 %v1628_v57  ;;  %v1625_v29 = vsel %vm656_vm1, %v5474_v43, -inf }
 0x2f9   : > { %1626 = vmax.xlane.f32.xlu1 %v1625_v29 }
 0x2fb   : > { %v4315_v62 = vpop.f32.mrb[8].mxu1 }
 0x2fc   : > { %v1573_v56 = vmul.f32 0.25, %v4315_v62  ;;  %1623 = vmax.xlane.f32.xlu0 %v1622_v8  ;;  %v1375_v39 = vpop.f32.mrb[9].mxu1 }
 0x2fd   : > { %v1572_v23 = vmul.f32 0.25, %v1375_v39  ;;  %1620 = vmax.xlane.f32.xlu1 %v1619_v7 }
 0x2fe   : > { %v5484_v12 = vsel %vm5418_vm3, -1e+30, %v1573_v56 }
 0x2ff   : > { %v5488_v34 = vsel %vm5418_vm3, -1e+30, %v1572_v23  ;;  %v1634_v39 = vsel %vm656_vm1, %v5484_v12, -inf }
 0x303   : > { %v4322_v35 = vpop.f32.mrb[18].mxu0 }
 0x304   : > { %v1575_v60 = vmul.f32 0.25, %v4322_v35  ;;  %v1464_v3 = vpop.f32.mrb[19].mxu0  ;;  %v1631_v35 = vsel %vm656_vm1, %v5488_v34, -inf }
 0x305   : > { %v1574_v46 = vmul.f32 0.25, %v1464_v3 }
 0x306   : > { %v5492_v57 = vsel %vm5418_vm3, -1e+30, %v1575_v60 }
 0x307   : > { %v1640_v29 = vsel %vm656_vm1, %v5492_v57, -inf  ;;  %v5498_v62 = vsel %vm5418_vm3, -1e+30, %v1574_v46 }
 0x308   : > { %1641 = vmax.xlane.f32.xlu0 %v1640_v29  ;;  %v1637_v8 = vsel %vm656_vm1, %v5498_v62, -inf }
 0x309   : > { %1638 = vmax.xlane.f32.xlu1 %v1637_v8 }
 0x30b   : > { %v4329_v56 = vpop.f32.mrb[10].mxu1 }
 0x30c   : > { %v1577_v7 = vmul.f32 0.25, %v4329_v56  ;;  %1635 = vmax.xlane.f32.xlu0 %v1634_v39  ;;  %v1553_v23 = vpop.f32.mrb[11].mxu1 }
 0x30d   : > { %v1576_v60 = vmul.f32 0.25, %v1553_v23  ;;  %1632 = vmax.xlane.f32.xlu1 %v1631_v35 }
 0x30e   : > { %v5508_v3 = vsel %vm5418_vm3, -1e+30, %v1577_v7 }
 0x30f   : > { %v1646_v46 = vsel %vm656_vm1, %v5508_v3, -inf  ;;  %v5514_v29 = vsel %vm5418_vm3, -1e+30, %v1576_v60 }
 0x310   : > { %1647 = vmax.xlane.f32.xlu0 %v1646_v46  ;;  %v1643_v8 = vsel %vm656_vm1, %v5514_v29, -inf }
 0x31e   : > { %4663 = vrot.lane.b32.xlu1 %v5314_v36, %s4912_s13 }
 0x326   : > { %4658 = vrot.lane.b32.xlu0 %v5307_v25, %s4912_s13 }
 0x342   : > { %1644 = vmax.xlane.f32.xlu1 %v1643_v8 }
 0x366   : > { %v1606_v56 = vpop.xlane.xlu1 %1605 }
 0x367   : > { %v1650_v39 = vsub.f32 %v5424_v40, %v1606_v56  ;;  %v1603_v7 = vpop.xlane.xlu0 %1602 }
 0x368   : > { %v1649_v23 = vsub.f32 %v5430_v26, %v1603_v7 }
 0x369   : > { %v1667_v10 = vmul.f32 1.442695, %v1650_v39 }
 0x36a   : > { %v1665_v35 = vmul.f32 1.442695, %v1649_v23 }
 0x36b   : > { %4702 = vpow2.f32 %v1667_v10 }
 0x36c   : > { %4704 = vpow2.f32 %v1665_v35 }
 0x36e   : > { %v1612_v60 = vpop.xlane.xlu0 %1611 }
 0x36f   : > { %v1652_v36 = vsub.f32 %v5436_v48, %v1612_v60 }
 0x371   : > { %v1671_v46 = vmul.f32 1.442695, %v1652_v36 }
 0x372   : > { %v1609_v0 = vpop.xlane.xlu0 %1608 }
 0x373   : > { %4706 = vpow2.f32 %v1671_v46  ;;  %v1651_v25 = vsub.f32 %v5442_v58, %v1609_v0 }
 0x375   : > { %v5526_v51 = vpop.eup %4702  ;;  %v1669_v8 = vmul.f32 1.442695, %v1651_v25 }
 0x376   : > { %v5528_v44 = vpop.eup %4704  ;;  %v1618_v40 = vpop.xlane.xlu0 %1617  ;;  %v1700_v26 = vsel %vm656_vm1, %v5526_v51, 0.0 }
 0x377   : > { %4708 = vpow2.f32 %v1669_v8  ;;  %v1654_v56 = vsub.f32 %v5448_v11, %v1618_v40  ;;  %v1615_v39 = vpop.xlane.xlu1 %1614  ;;  %1701 = vadd.xlane.f32.xlu0 %v1700_v26  ;;  %v1697_v48 = vsel %vm656_vm1, %v5528_v44, 0.0 }
 0x378   : > { %v1653_v7 = vsub.f32 %v5454_v28, %v1615_v39  ;;  %1698 = vadd.xlane.f32.xlu1 %v1697_v48 }
 0x379   : > { %v1675_v0 = vmul.f32 1.442695, %v1654_v56 }
 0x37a   : > { %v1673_v58 = vmul.f32 1.442695, %v1653_v7 }
 0x37b   : > { %4710 = vpow2.f32 %v1675_v0 }
 0x37c   : > { %4712 = vpow2.f32 %v1673_v58 }
 0x37d   : > { %v5536_v23 = vpop.eup %4706 }
 0x37e   : > { %v1706_v10 = vsel %vm656_vm1, %v5536_v23, 0.0 }
 0x37f   : > { %1707 = vadd.xlane.f32.xlu0 %v1706_v10 }
 0x381   : > { %v5540_v35 = vpop.eup %4708 }
 0x382   : > { %v1703_v11 = vsel %vm656_vm1, %v5540_v35, 0.0 }
 0x383   : > { %1704 = vadd.xlane.f32.xlu1 %v1703_v11 }
 0x385   : > { %v5544_v60 = vpop.eup %4710  ;;  %v1630_v28 = vpop.xlane.xlu0 %1629 }
 0x386   : > { %v5546_v36 = vpop.eup %4712  ;;  %v1658_v46 = vsub.f32 %v5468_v53, %v1630_v28  ;;  %v1627_v25 = vpop.xlane.xlu1 %1626  ;;  %v1712_v8 = vsel %vm656_vm1, %v5544_v60, 0.0 }
 0x387   : > { %v1657_v40 = vsub.f32 %v5474_v43, %v1627_v25  ;;  %1713 = vadd.xlane.f32.xlu0 %v1712_v8  ;;  %v1709_v26 = vsel %vm656_vm1, %v5546_v36, 0.0 }
 0x388   : > { %v1683_v56 = vmul.f32 1.442695, %v1658_v46  ;;  %1710 = vadd.xlane.f32.xlu1 %v1709_v26 }
 0x389   : > { %v1681_v39 = vmul.f32 1.442695, %v1657_v40  ;;  %v1624_v48 = vpop.xlane.xlu0 %1623 }
 0x38a   : > { %4714 = vpow2.f32 %v1683_v56  ;;  %v1656_v7 = vsub.f32 %v5460_v33, %v1624_v48  ;;  %v1621_v0 = vpop.xlane.xlu1 %1620 }
 0x38b   : > { %4716 = vpow2.f32 %v1681_v39  ;;  %v1655_v53 = vsub.f32 %v5464_v19, %v1621_v0 }
 0x38c   : > { %v1679_v58 = vmul.f32 1.442695, %v1656_v7 }
 0x38d   : > { %v1677_v10 = vmul.f32 1.442695, %v1655_v53 }
 0x38e   : > { %4718 = vpow2.f32 %v1679_v58 }
 0x38f   : > { %4720 = vpow2.f32 %v1677_v10 }
 0x394   : > { %v5556_v43 = vpop.eup %4714 }
 0x395   : > { %v5558_v11 = vpop.eup %4716  ;;  %v1642_v28 = vpop.xlane.xlu0 %1641  ;;  %v1724_v46 = vsel %vm656_vm1, %v5556_v43, 0.0 }
 0x396   : > { %v1662_v25 = vsub.f32 %v5492_v57, %v1642_v28  ;;  %v1639_v8 = vpop.xlane.xlu1 %1638  ;;  %1725 = vadd.xlane.f32.xlu0 %v1724_v46  ;;  %v1721_v33 = vsel %vm656_vm1, %v5558_v11, 0.0 }
 0x397   : > { %v1661_v19 = vsub.f32 %v5498_v62, %v1639_v8  ;;  %1722 = vadd.xlane.f32.xlu1 %v1721_v33 }
 0x398   : > { %v5566_v40 = vpop.eup %4718  ;;  %v1691_v26 = vmul.f32 1.442695, %v1662_v25 }
 0x399   : > { %v5568_v56 = vpop.eup %4720  ;;  %v1689_v39 = vmul.f32 1.442695, %v1661_v19  ;;  %v1636_v48 = vpop.xlane.xlu0 %1635  ;;  %v1718_v7 = vsel %vm656_vm1, %v5566_v40, 0.0 }
 0x39a   : > { %4722 = vpow2.f32 %v1691_v26  ;;  %v1660_v57 = vsub.f32 %v5484_v12, %v1636_v48  ;;  %v1633_v0 = vpop.xlane.xlu1 %1632  ;;  %1719 = vadd.xlane.f32.xlu0 %v1718_v7  ;;  %v1715_v53 = vsel %vm656_vm1, %v5568_v56, 0.0 }
 0x39b   : > { %v1659_v62 = vsub.f32 %v5488_v34, %v1633_v0  ;;  %1716 = vadd.xlane.f32.xlu1 %v1715_v53  ;;  %4724 = vpow2.f32 %v1689_v39 }
 0x39c   : > { %v1687_v58 = vmul.f32 1.442695, %v1660_v57 }
 0x39d   : > { %v1685_v10 = vmul.f32 1.442695, %v1659_v62  ;;  %v1648_v28 = vpop.xlane.xlu0 %1647 }
 0x39e   : > { %v1664_v46 = vsub.f32 %v5508_v3, %v1648_v28  ;;  %v4664_v25 = vpop.permute.xlu1 %4663 }
 0x39f   : > { %4726 = vpow2.f32 %v1685_v10  ;;  %v4666_v8 = vunpack.i.h.bf16 %v4664_v25  ;;  %v4665_v33 = vunpack.i.l.bf16 %v4664_v25 }
 0x3a0   : > { %4728 = vpow2.f32 %v1687_v58  ;;  %v1695_v12 = vmul.f32 1.442695, %v1664_v46 }
 0x3a1   : > { %v4659_v19 = vpop.permute.xlu0 %4658  ;;  %v4530_v26 = vpack.c.bf16 %v4666_v8, %v4665_v33 }
 0x3a2   : > { %v4661_v48 = vunpack.i.h.bf16 %v4659_v19  ;;  %v4660_v7 = vunpack.i.l.bf16 %v4659_v19  ;;  %4730 = vpow2.f32 %v1695_v12 }
 0x3a3   : > { %4531 = vmatprep.subr.bf16.mxu1 %v4530_v26 }
 0x3a4   : > { %v5577_v37 = vpop.eup %4722  ;;  %4533 = vmatpush3.bf16.msra.mxu1 %v4530_v26  ;;  %v4526_v34 = vpack.c.bf16 %v4661_v48, %v4660_v7 }
 0x3a5   : > { %v1736_v39 = vsel %vm656_vm1, %v5577_v37, 0.0  ;;  %v5581_v3 = vpop.eup %4724 }
 0x3a6   : > { %1737 = vadd.xlane.f32.xlu0 %v1736_v39  ;;  %4527 = vmatprep.subr.bf16.mxu0 %v4526_v34  ;;  %v1733_v0 = vsel %vm656_vm1, %v5581_v3, 0.0 }
 0x3a9   : > { %v5583_v57 = vpop.eup %4726 }
 0x3aa   : > { %v5587_v53 = vpop.eup %4728  ;;  %1734 = vadd.xlane.f32.xlu0 %v1733_v0  ;;  %v1727_v62 = vsel %vm656_vm1, %v5583_v57, 0.0 }
 0x3ab   : > { %1728 = vadd.xlane.f32.xlu1 %v1727_v62  ;;  %v1730_v58 = vsel %vm656_vm1, %v5587_v53, 0.0 }
 0x3ac   : > { %v5593_v10 = vpop.eup %4730 }
 0x3ad   : > { %v1742_v28 = vsel %vm656_vm1, %v5593_v10, 0.0 }
 0x3ae   : > { %1731 = vadd.xlane.f32.xlu0 %v1730_v58 }
 0x3b2   : > { %1743 = vadd.xlane.f32.xlu0 %v1742_v28 }
 0x3bc   : > { %4673 = vrot.lane.b32.xlu1 %v5329_v4, %s4912_s13 }
 0x3c0   : > { %4678 = vrot.lane.b32.xlu1 %v5336_v47, %s4912_s13 }
 0x3c4   : > { %4683 = vrot.lane.b32.xlu1 %v5343_v21, %s4912_s13 }
 0x3c8   : > { %4668 = vrot.lane.b32.xlu0 %v5321_v54, %s4912_s13 }
 0x3cf   : > { %v1645_v46 = vpop.xlane.xlu1 %1644 }
 0x3d0   : > { %v1663_v25 = vsub.f32 %v5514_v29, %v1645_v46 }
 0x3d2   : > { %v1693_v8 = vmul.f32 1.442695, %v1663_v25 }
 0x3d4   : > { %4732 = vpow2.f32 %v1693_v8 }
 0x3de   : > { %v5606_v33 = vpop.eup %4732 }
 0x3df   : > { %v1739_v12 = vsel %vm656_vm1, %v5606_v33, 0.0 }
 0x3e8   : > { %1740 = vadd.xlane.f32.xlu1 %v1739_v12 }
 0x3f9   : > { %4688 = vrot.lane.b32.xlu1 %v5350_v49, %s4912_s13 }
 0x404   : > { %v1702_v4 = vpop.xlane.xlu0 %1701 }
 0x405   : > { %4734 = vrcp.f32 %v1702_v4  ;;  %v1699_v21 = vpop.xlane.xlu1 %1698 }
 0x406   : > { %4736 = vrcp.f32 %v1699_v21 }
 0x40c   : > { %v1708_v47 = vpop.xlane.xlu0 %1707 }
 0x40d   : > { %4738 = vrcp.f32 %v1708_v47 }
 0x40f   : > { %v4735_v54 = vpop.eup %4734 }
 0x410   : > { %v4737_v19 = vpop.eup %4736  ;;  %v1705_v29 = vpop.xlane.xlu1 %1704  ;;  %v1762_v48 = vmul.f32 %v4735_v54, %v5526_v51 }
 0x411   : > { %4740 = vrcp.f32 %v1705_v29  ;;  %v1761_v26 = vmul.f32 %v4737_v19, %v5528_v44 }
 0x413   : > { %4334 = vmatprep.mubr.msk.f32.mxu0 %vm656_vm1, %v1761_v26 }
 0x414   : > { %v1714_v7 = vpop.xlane.xlu0 %1713  ;;  %4335 = vmatmul.mubr.msk.f32.vlgmr.msra.gmra.mrb[20].mxu0 %vm656_vm1, %v1762_v48 }
 0x415   : > { %4742 = vrcp.f32 %v1714_v7  ;;  %4529 = vmatpush3.bf16.msra.mxu0 %v4526_v34  ;;  %v1711_v49 = vpop.xlane.xlu1 %1710 }
 0x416   : > { %4744 = vrcp.f32 %v1711_v49 }
 0x417   : > { %v4739_v39 = vpop.eup %4738 }
 0x418   : > { %v1764_v58 = vmul.f32 %v4739_v39, %v5536_v23 }
 0x41b   : > { %v4741_v0 = vpop.eup %4740 }
 0x41c   : > { %v1763_v62 = vmul.f32 %v4741_v0, %v5540_v35 }
 0x41e   : > { %4341 = vmatprep.mubr.msk.f32.mxu0 %vm656_vm1, %v1763_v62 }
 0x41f   : > { %v4743_v44 = vpop.eup %4742  ;;  %4342 = vmatmul.mubr.msk.f32.vlgmr.msra.gmra.mrb[22].mxu0 %vm656_vm1, %v1764_v58 }
 0x420   : > { %v4745_v51 = vpop.eup %4744  ;;  %v1766_v46 = vmul.f32 %v4743_v44, %v5544_v60 }
 0x421   : > { %v1765_v28 = vmul.f32 %v4745_v51, %v5546_v36 }
 0x423   : > { %4348 = vmatprep.mubr.msk.f32.mxu1 %vm656_vm1, %v1765_v28  ;;  %v1726_v35 = vpop.xlane.xlu0 %1725 }
 0x424   : > { %4349 = vmatmul.mubr.msk.f32.vlgmr.msra.gmra.mrb[12].mxu1 %vm656_vm1, %v1766_v46  ;;  %v1723_v34 = vpop.xlane.xlu1 %1722 }
 0x425   : > { %4746 = vrcp.f32 %v1723_v34 }
 0x427   : > { %v1720_v8 = vpop.xlane.xlu0 %1719 }
 0x428   : > { %v1717_v25 = vpop.xlane.xlu1 %1716 }
 0x429   : > { %4748 = vrcp.f32 %v1717_v25 }
 0x42a   : > { %4750 = vrcp.f32 %v1726_v35 }
 0x42f   : > { %v4747_v23 = vpop.eup %4746 }
 0x430   : > { %v1769_v12 = vmul.f32 %v4747_v23, %v5558_v11  ;;  %v5635_v23 = vld [vmem:[%s6452_s6] sm:$0xff] }
 0x432   : > { %4362 = vmatprep.mubr.msk.f32.mxu1 %vm656_vm1, %v1769_v12 }
 0x433   : > { %v4749_v4 = vpop.eup %4748  ;;  %v1738_v21 = vpop.xlane.xlu0 %1737 }
 0x434   : > { %v1767_v36 = vmul.f32 %v4749_v4, %v5568_v56  ;;  %v4751_v7 = vpop.eup %4750 }
 0x435   : > { %v1770_v39 = vmul.f32 %v4751_v7, %v5556_v43  ;;  %v5640_v43 = vld [vmem:[%s6452_s6 + $0x8] sm:$0xff] }
 0x436   : > { %4355 = vmatprep.mubr.msk.f32.mxu0 %vm656_vm1, %v1767_v36  ;;  %v4554_v36 = vpack.c.bf16 %v5640_v43, %v5635_v23 }
 0x437   : > { %v1735_v60 = vpop.xlane.xlu0 %1734 }
 0x438   : > { %4752 = vrcp.f32 %v1735_v60  ;;  %v1729_v47 = vpop.xlane.xlu1 %1728 }
 0x439   : > { %4754 = vrcp.f32 %v1720_v8 }
 0x43a   : > { %4756 = vrcp.f32 %v1729_v47 }
 0x43b   : > { %v1732_v54 = vpop.xlane.xlu0 %1731  ;;  %4758 = vrcp.f32 %v1738_v21 }
 0x43c   : > { %v4674_v19 = vpop.permute.xlu1 %4673  ;;  %4760 = vrcp.f32 %v1732_v54 }
 0x43d   : > { %v4676_v29 = vunpack.i.h.bf16 %v4674_v19  ;;  %v4675_v26 = vunpack.i.l.bf16 %v4674_v19 }
 0x43f   : > { %v4538_v11 = vpack.c.bf16 %v4676_v29, %v4675_v26  ;;  %v1744_v48 = vpop.xlane.xlu0 %1743 }
 0x440   : > { %v4679_v49 = vpop.permute.xlu1 %4678  ;;  %4762 = vrcp.f32 %v1744_v48 }
 0x441   : > { %4539 = vmatprep.subr.bf16.mxu1 %v4538_v11  ;;  %v4681_v58 = vunpack.i.h.bf16 %v4679_v49  ;;  %v4680_v44 = vunpack.i.l.bf16 %v4679_v49 }
 0x442   : > { %v4753_v56 = vpop.eup %4752  ;;  %4541 = vmatpush3.bf16.msra.mxu1 %v4538_v11 }
 0x443   : > { %v4669_v0 = vpop.permute.xlu0 %4668  ;;  %v1773_v62 = vmul.f32 %v4753_v56, %v5581_v3  ;;  %v4755_v3 = vpop.eup %4754  ;;  %v4542_v4 = vpack.c.bf16 %v4681_v58, %v4680_v44 }
 0x444   : > { %v4671_v51 = vunpack.i.h.bf16 %v4669_v0  ;;  %v4670_v28 = vunpack.i.l.bf16 %v4669_v0  ;;  %v4684_v46 = vpop.permute.xlu1 %4683  ;;  %v4757_v12 = vpop.eup %4756  ;;  %v1768_v60 = vmul.f32 %v4755_v3, %v5566_v40 }
 0x445   : > { %v4686_v34 = vunpack.i.h.bf16 %v4684_v46  ;;  %v4685_v25 = vunpack.i.l.bf16 %v4684_v46  ;;  %4363 = vmatmul.mubr.msk.f32.vlgmr.msra.gmra.mrb[14].mxu1 %vm656_vm1, %v1770_v39  ;;  %v4759_v21 = vpop.eup %4758  ;;  %v1771_v54 = vmul.f32 %v4757_v12, %v5583_v57 }
 0x446   : > { %v4534_v35 = vpack.c.bf16 %v4671_v51, %v4670_v28  ;;  %4376 = vmatprep.mubr.msk.f32.mxu1 %vm656_vm1, %v1773_v62  ;;  %v4761_v47 = vpop.eup %4760  ;;  %v1774_v19 = vmul.f32 %v4759_v21, %v5577_v37 }
 0x447   : > { %v4546_v8 = vpack.c.bf16 %v4686_v34, %v4685_v25  ;;  %v1772_v29 = vmul.f32 %v4761_v47, %v5587_v53 }
 0x448   : > { %4535 = vmatprep.subr.bf16.mxu0 %v4534_v35 }
 0x449   : > { %4537 = vmatpush3.bf16.msra.mxu0 %v4534_v35  ;;  %4547 = vmatprep.subr.bf16.mxu1 %v4546_v8 }
 0x44a   : > { %4543 = vmatprep.subr.bf16.mxu0 %v4542_v4  ;;  %4549 = vmatpush3.bf16.msra.mxu1 %v4546_v8  ;;  %v4763_v37 = vpop.eup %4762 }
 0x44b   : > { %4566 = vmatprep.subr.bf16.mxu1 %v4554_v36  ;;  %v1776_v53 = vmul.f32 %v4763_v37, %v5593_v10 }
 0x44c   : > { %4356 = vmatmul.mubr.msk.f32.vlgmr.msra.gmra.mrb[24].mxu0 %vm656_vm1, %v1768_v60 }
 0x44d   : > { %4545 = vmatpush3.bf16.msra.mxu0 %v4542_v4  ;;  %4369 = vmatprep.mubr.msk.f32.mxu0 %vm656_vm1, %v1771_v54 }
 0x44e   : > { %4377 = vmatmul.mubr.msk.f32.vlgmr.msra.gmra.mrb[16].mxu1 %vm656_vm1, %v1774_v19 }
 0x44f   : > { %4567 = vmatpush3.bf16.msra.mxu1 %v4554_v36 }
 0x450   : > { %4370 = vmatmul.mubr.msk.f32.vlgmr.msra.gmra.mrb[26].mxu0 %vm656_vm1, %v1772_v29 }
 0x475   : > { %v1741_v40 = vpop.xlane.xlu1 %1740 }
 0x476   : > { %4764 = vrcp.f32 %v1741_v40 }
 0x479   : > { %v4689_v26 = vpop.permute.xlu1 %4688 }
 0x47a   : > { %v4691_v57 = vunpack.i.h.bf16 %v4689_v26  ;;  %v4690_v11 = vunpack.i.l.bf16 %v4689_v26 }
 0x47c   : > { %v4550_v7 = vpack.c.bf16 %v4691_v57, %v4690_v11 }
 0x47e   : > { %4551 = vmatprep.subr.bf16.mxu0 %v4550_v7 }
 0x47f   : > { %4553 = vmatpush3.bf16.msra.mxu0 %v4550_v7 }
 0x480   : > { %v4765_v49 = vpop.eup %4764  ;;  %4555 = vmatprep.subr.bf16.mxu0 %v4554_v36 }
 0x481   : > { %v1775_v56 = vmul.f32 %v4765_v49, %v5606_v33 }
 0x483   : > { %4383 = vmatprep.mubr.msk.f32.mxu0 %vm656_vm1, %v1775_v56 }
 0x484   : > { %4384 = vmatmul.mubr.msk.f32.vlgmr.msra.gmra.mrb[28].mxu0 %vm656_vm1, %v1776_v53 }
 0x485   : > { %4557 = vmatpush3.bf16.msra.mxu0 %v4554_v36 }
 0x4e7   : > { %v4336_v48 = vpop.f32.mrb[20].mxu0 }
 0x4e8   : > { %v1855_v39 = vpop.f32.mrb[21].mxu0 }
 0x4e9   : > { %4390 = vmatprep.mubr.msk.f32.mxu0 %vm656_vm1, %v1855_v39 }
 0x4ea   : > { %4391 = vmatmul.mubr.msk.f32.vlgmr.msra.gmra.mrb[30].mxu0 %vm656_vm1, %v4336_v48 }
 0x4f2   : > { %v4343_v0 = vpop.f32.mrb[22].mxu0 }
 0x4f3   : > { %v1942_v62 = vpop.f32.mrb[23].mxu0 }
 0x4f4   : > { %4393 = vmatprep.mubr.msk.f32.mxu0 %vm656_vm1, %v1942_v62 }
 0x4f5   : > { %4394 = vmatmul.mubr.msk.f32.gmra.mrb[32].mxu0 %vm656_vm1, %v4343_v0 }
 0x4f7   : > { %v4350_v33 = vpop.f32.mrb[12].mxu1 }
 0x4f8   : > { %v2029_v58 = vpop.f32.mrb[13].mxu1 }
 0x4f9   : > { %4396 = vmatprep.mubr.msk.f32.mxu0 %vm656_vm1, %v2029_v58 }
 0x4fa   : > { %4397 = vmatmul.mubr.msk.f32.gmra.mrb[34].mxu0 %vm656_vm1, %v4350_v33 }
 0x518   : > { %v4364_v10 = vpop.f32.mrb[14].mxu1 }
 0x519   : > { %v2203_v44 = vpop.f32.mrb[15].mxu1 }
 0x51f   : > { %v4357_v51 = vpop.f32.mrb[24].mxu0 }
 0x520   : > { %v2116_v28 = vpop.f32.mrb[25].mxu0 }
 0x521   : > { %v4378_v46 = vpop.f32.mrb[16].mxu1  ;;  %4399 = vmatprep.mubr.msk.f32.mxu1 %vm656_vm1, %v2116_v28 }
 0x522   : > { %v2377_v34 = vpop.f32.mrb[17].mxu1  ;;  %4400 = vmatmul.mubr.msk.f32.vlgmr.msra.gmra.mrb[18].mxu1 %vm656_vm1, %v4357_v51 }
 0x523   : > { %v4371_v25 = vpop.f32.mrb[26].mxu0  ;;  %4402 = vmatprep.mubr.msk.f32.mxu1 %vm656_vm1, %v2203_v44 }
 0x524   : > { %v2290_v35 = vpop.f32.mrb[27].mxu0 }
 0x526   : > { %4403 = vmatmul.mubr.msk.f32.gmra.mrb[20].mxu1 %vm656_vm1, %v4364_v10 }
 0x527   : > { %4405 = vmatprep.mubr.msk.f32.mxu1 %vm656_vm1, %v2290_v35 }
 0x52a   : > { %4406 = vmatmul.mubr.msk.f32.gmra.mrb[22].mxu1 %vm656_vm1, %v4371_v25 }
 0x52b   : > { %4408 = vmatprep.mubr.msk.f32.mxu1 %vm656_vm1, %v2377_v34 }
 0x52e   : > { %4409 = vmatmul.mubr.msk.f32.gmra.mrb[24].mxu1 %vm656_vm1, %v4378_v46 }
 0x557   : > { %v4385_v3 = vpop.f32.mrb[28].mxu0 }
 0x558   : > { %v2464_v8 = vpop.f32.mrb[29].mxu0 }
 0x559   : > { %4411 = vmatprep.mubr.msk.f32.mxu1 %vm656_vm1, %v2464_v8 }
 0x55a   : > { %4412 = vmatmul.mubr.msk.f32.gmra.mrb[26].mxu1 %vm656_vm1, %v4385_v3 }
 0x5bd   : > { %v4392_v12 = vpop.f32.mrb[30].mxu0 }
 0x5be   : > { %v2599_v4 = vadd.f32 %v4392_v12, %v5039_v9  ;;  %v2593_v21 = vpop.f32.mrb[31].mxu0 }
 0x5bf   : > { %v2594_v36 = vadd.f32 %v2593_v21, %v5039_v9 }
 0x5c0   : > { %v5675_v60 = vadd.f32 %v2599_v4, %v5138_v20 }
 0x5c1   : > { %v5678_v47 = vadd.f32 %v2594_v36, %v5141_v22 }
 0x5c2   : > { %v2691_v54 = vsel %vm656_vm1, %v5675_v60, 0.0 }
 0x5c3   : > { %2692 = vadd.xlane.f32.xlu1 %v2691_v54  ;;  %v2688_v19 = vsel %vm656_vm1, %v5678_v47, 0.0 }
 0x5c4   : > { %2689 = vadd.xlane.f32.xlu0 %v2688_v19 }
 0x5c8   : > { %v4395_v29 = vpop.f32.mrb[32].mxu0 }
 0x5c9   : > { %v2603_v40 = vpop.f32.mrb[33].mxu0  ;;  %v2609_v26 = vadd.f32 %v4395_v29, %v5039_v9 }
 0x5ca   : > { %v2604_v57 = vadd.f32 %v2603_v40, %v5039_v9 }
 0x5cb   : > { %v5693_v53 = vadd.f32 %v2609_v26, %v5167_v38 }
 0x5cc   : > { %v5687_v11 = vadd.f32 %v2604_v57, %v5156_v31 }
 0x5cd   : > { %v4398_v7 = vpop.f32.mrb[34].mxu0  ;;  %v2697_v0 = vsel %vm656_vm1, %v5693_v53, 0.0 }
 0x5ce   : > { %v2619_v37 = vadd.f32 %v4398_v7, %v5039_v9  ;;  %v2613_v49 = vpop.f32.mrb[35].mxu0  ;;  %v2694_v56 = vsel %vm656_vm1, %v5687_v11, 0.0 }
 0x5cf   : > { %v2614_v48 = vadd.f32 %v2613_v49, %v5039_v9  ;;  %2695 = vadd.xlane.f32.xlu0 %v2694_v56 }
 0x5d0   : > { %v5702_v62 = vadd.f32 %v2619_v37, %v5189_v52 }
 0x5d1   : > { %v5697_v39 = vadd.f32 %v2614_v48, %v5178_v45 }
 0x5d2   : > { %v2703_v58 = vsel %vm656_vm1, %v5702_v62, 0.0 }
 0x5d3   : > { %2698 = vadd.xlane.f32.xlu0 %v2697_v0  ;;  %v2700_v33 = vsel %vm656_vm1, %v5697_v39, 0.0 }
 0x5d4   : > { %2701 = vadd.xlane.f32.xlu1 %v2700_v33 }
 0x5d7   : > { %2704 = vadd.xlane.f32.xlu0 %v2703_v58 }
 0x5f5   : > { %v4401_v10 = vpop.f32.mrb[18].mxu1 }
 0x5f6   : > { %v2629_v44 = vadd.f32 %v4401_v10, %v5039_v9  ;;  %v2623_v51 = vpop.f32.mrb[19].mxu1 }
 0x5f7   : > { %v2624_v28 = vadd.f32 %v2623_v51, %v5039_v9 }
 0x5f8   : > { %v5711_v46 = vadd.f32 %v2629_v44, %v5211_v18 }
 0x5f9   : > { %v4404_v34 = vpop.f32.mrb[20].mxu1  ;;  %v5714_v25 = vadd.f32 %v2624_v28, %v5200_v1 }
 0x5fa   : > { %v2639_v35 = vadd.f32 %v4404_v34, %v5039_v9  ;;  %v2633_v3 = vpop.f32.mrb[21].mxu1  ;;  %v2709_v8 = vsel %vm656_vm1, %v5711_v46, 0.0 }
 0x5fb   : > { %v2634_v12 = vadd.f32 %v2633_v3, %v5039_v9  ;;  %2710 = vadd.xlane.f32.xlu0 %v2709_v8  ;;  %v2706_v4 = vsel %vm656_vm1, %v5714_v25, 0.0 }
 0x5fc   : > { %2707 = vadd.xlane.f32.xlu1 %v2706_v4  ;;  %v5723_v21 = vadd.f32 %v2639_v35, %v5233_v41 }
 0x5fd   : > { %v4407_v36 = vpop.f32.mrb[22].mxu1  ;;  %v5726_v54 = vadd.f32 %v2634_v12, %v5222_v32 }
 0x5fe   : > { %v2649_v19 = vadd.f32 %v4407_v36, %v5039_v9  ;;  %v2643_v29 = vpop.f32.mrb[23].mxu1  ;;  %v2715_v40 = vsel %vm656_vm1, %v5723_v21, 0.0 }
 0x5ff   : > { %v2644_v26 = vadd.f32 %v2643_v29, %v5039_v9  ;;  %2716 = vadd.xlane.f32.xlu0 %v2715_v40  ;;  %v2712_v57 = vsel %vm656_vm1, %v5726_v54, 0.0 }
 0x600   : > { %2713 = vadd.xlane.f32.xlu1 %v2712_v57  ;;  %v5735_v7 = vadd.f32 %v2649_v19, %v5255_v5 }
 0x601   : > { %v4410_v37 = vpop.f32.mrb[24].mxu1  ;;  %v5738_v49 = vadd.f32 %v2644_v26, %v5244_v50 }
 0x602   : > { %v2659_v56 = vadd.f32 %v4410_v37, %v5039_v9  ;;  %v2653_v48 = vpop.f32.mrb[25].mxu1  ;;  %v2721_v0 = vsel %vm656_vm1, %v5735_v7, 0.0 }
 0x603   : > { %v2654_v33 = vadd.f32 %v2653_v48, %v5039_v9  ;;  %2722 = vadd.xlane.f32.xlu0 %v2721_v0  ;;  %v2718_v58 = vsel %vm656_vm1, %v5738_v49, 0.0 }
 0x604   : > { %2719 = vadd.xlane.f32.xlu1 %v2718_v58  ;;  %v5747_v10 = vadd.f32 %v2659_v56, %v5277_v42 }
 0x605   : > { %v5750_v44 = vadd.f32 %v2654_v33, %v5266_v27 }
 0x606   : > { %v2727_v51 = vsel %vm656_vm1, %v5747_v10, 0.0 }
 0x607   : > { %2728 = vadd.xlane.f32.xlu0 %v2727_v51  ;;  %v2724_v28 = vsel %vm656_vm1, %v5750_v44, 0.0 }
 0x608   : > { %2725 = vadd.xlane.f32.xlu1 %v2724_v28 }
 0x62d   : > { %v4413_v34 = vpop.f32.mrb[26].mxu1 }
 0x62e   : > { %v2669_v35 = vadd.f32 %v4413_v34, %v5039_v9  ;;  %v2663_v3 = vpop.f32.mrb[27].mxu1 }
 0x62f   : > { %v2664_v8 = vadd.f32 %v2663_v3, %v5039_v9 }
 0x630   : > { %v5759_v12 = vadd.f32 %v2669_v35, %v5292_v61 }
 0x631   : > { %v5762_v4 = vadd.f32 %v2664_v8, %v5286_v55 }
 0x632   : > { %v2733_v36 = vsel %vm656_vm1, %v5759_v12, 0.0 }
 0x633   : > { %2734 = vadd.xlane.f32.xlu0 %v2733_v36  ;;  %v2730_v19 = vsel %vm656_vm1, %v5762_v4, 0.0 }
 0x634   : > { %2731 = vadd.xlane.f32.xlu1 %v2730_v19 }
 0x650   : > { %v2693_v29 = vpop.xlane.xlu1 %2692 }
 0x651   : > { %v2738_v40 = vmul.f32 0.0625, %v2693_v29  ;;  %v2690_v26 = vpop.xlane.xlu0 %2689 }
 0x652   : > { %v2737_v57 = vmul.f32 0.0625, %v2690_v26 }
 0x653   : > { %v5769_v9 = vsub.f32 %v5675_v60, %v2738_v40 }
 0x654   : > { %v5772_v37 = vsub.f32 %v5678_v47, %v2737_v57 }
 0x655   : > { %v2770_v56 = vmul.f32 %v5769_v9, %v5769_v9 }
 0x656   : > { %v2769_v48 = vmul.f32 %v5772_v37, %v5772_v37 }
 0x657   : > { %v2788_v0 = vsel %vm656_vm1, %v2770_v56, 0.0 }
 0x658   : > { %2789 = vadd.xlane.f32.xlu0 %v2788_v0  ;;  %v2785_v33 = vsel %vm656_vm1, %v2769_v48, 0.0 }
 0x659   : > { %2786 = vadd.xlane.f32.xlu1 %v2785_v33 }
 0x65c   : > { %v2696_v58 = vpop.xlane.xlu0 %2695 }
 0x65d   : > { %v2739_v51 = vmul.f32 0.0625, %v2696_v58 }
 0x65f   : > { %v5781_v60 = vsub.f32 %v5687_v11, %v2739_v51 }
 0x660   : > { %v2699_v28 = vpop.xlane.xlu0 %2698 }
 0x661   : > { %v2740_v47 = vmul.f32 0.0625, %v2699_v28  ;;  %v2702_v34 = vpop.xlane.xlu1 %2701  ;;  %v2771_v35 = vmul.f32 %v5781_v60, %v5781_v60 }
 0x662   : > { %v2741_v3 = vmul.f32 0.0625, %v2702_v34 }
 0x663   : > { %v5786_v8 = vsub.f32 %v5693_v53, %v2740_v47  ;;  %v2791_v36 = vsel %vm656_vm1, %v2771_v35, 0.0 }
 0x664   : > { %v5790_v19 = vsub.f32 %v5697_v39, %v2741_v3  ;;  %v2705_v29 = vpop.xlane.xlu0 %2704  ;;  %2792 = vadd.xlane.f32.xlu1 %v2791_v36 }
 0x665   : > { %v2742_v40 = vmul.f32 0.0625, %v2705_v29  ;;  %v2772_v11 = vmul.f32 %v5786_v8, %v5786_v8 }
 0x666   : > { %v2773_v26 = vmul.f32 %v5790_v19, %v5790_v19 }
 0x667   : > { %v5797_v57 = vsub.f32 %v5702_v62, %v2742_v40  ;;  %v2794_v53 = vsel %vm656_vm1, %v2772_v11, 0.0 }
 0x668   : > { %2795 = vadd.xlane.f32.xlu0 %v2794_v53  ;;  %v2797_v56 = vsel %vm656_vm1, %v2773_v26, 0.0 }
 0x669   : > { %2798 = vadd.xlane.f32.xlu1 %v2797_v56  ;;  %v2774_v39 = vmul.f32 %v5797_v57, %v5797_v57 }
 0x66b   : > { %v2800_v48 = vsel %vm656_vm1, %v2774_v39, 0.0 }
 0x66c   : > { %2801 = vadd.xlane.f32.xlu0 %v2800_v48 }
 0x688   : > { %v2711_v0 = vpop.xlane.xlu0 %2710 }
 0x689   : > { %v2744_v33 = vmul.f32 0.0625, %v2711_v0  ;;  %v2708_v58 = vpop.xlane.xlu1 %2707 }
 0x68a   : > { %v2743_v51 = vmul.f32 0.0625, %v2708_v58 }
 0x68b   : > { %v5805_v28 = vsub.f32 %v5711_v46, %v2744_v33 }
 0x68c   : > { %v5808_v62 = vsub.f32 %v5714_v25, %v2743_v51  ;;  %v2717_v47 = vpop.xlane.xlu0 %2716 }
 0x68d   : > { %v2746_v34 = vmul.f32 0.0625, %v2717_v47  ;;  %v2714_v35 = vpop.xlane.xlu1 %2713  ;;  %v2776_v3 = vmul.f32 %v5805_v28, %v5805_v28 }
 0x68e   : > { %v2745_v36 = vmul.f32 0.0625, %v2714_v35  ;;  %v2775_v29 = vmul.f32 %v5808_v62, %v5808_v62 }
 0x68f   : > { %v5815_v40 = vsub.f32 %v5723_v21, %v2746_v34  ;;  %v2806_v11 = vsel %vm656_vm1, %v2776_v3, 0.0 }
 0x690   : > { %v5819_v46 = vsub.f32 %v5726_v54, %v2745_v36  ;;  %v2723_v25 = vpop.xlane.xlu0 %2722  ;;  %2807 = vadd.xlane.f32.xlu0 %v2806_v11  ;;  %v2803_v26 = vsel %vm656_vm1, %v2775_v29, 0.0 }
 0x691   : > { %v2748_v53 = vmul.f32 0.0625, %v2723_v25  ;;  %2804 = vadd.xlane.f32.xlu1 %v2803_v26  ;;  %v2720_v56 = vpop.xlane.xlu1 %2719  ;;  %v2778_v39 = vmul.f32 %v5815_v40, %v5815_v40 }
 0x692   : > { %v2747_v48 = vmul.f32 0.0625, %v2720_v56  ;;  %v2777_v21 = vmul.f32 %v5819_v46, %v5819_v46 }
 0x693   : > { %v5827_v0 = vsub.f32 %v5735_v7, %v2748_v53  ;;  %v2812_v54 = vsel %vm656_vm1, %v2778_v39, 0.0 }
 0x694   : > { %v5831_v33 = vsub.f32 %v5738_v49, %v2747_v48  ;;  %v2729_v58 = vpop.xlane.xlu0 %2728  ;;  %2813 = vadd.xlane.f32.xlu0 %v2812_v54  ;;  %v2809_v51 = vsel %vm656_vm1, %v2777_v21, 0.0 }
 0x695   : > { %v2750_v47 = vmul.f32 0.0625, %v2729_v58  ;;  %2810 = vadd.xlane.f32.xlu1 %v2809_v51  ;;  %v2726_v34 = vpop.xlane.xlu1 %2725  ;;  %v2780_v35 = vmul.f32 %v5827_v0, %v5827_v0 }
 0x696   : > { %v2749_v3 = vmul.f32 0.0625, %v2726_v34  ;;  %v2779_v7 = vmul.f32 %v5831_v33, %v5831_v33 }
 0x697   : > { %v5839_v36 = vsub.f32 %v5747_v10, %v2750_v47  ;;  %v2818_v49 = vsel %vm656_vm1, %v2780_v35, 0.0 }
 0x698   : > { %v5843_v29 = vsub.f32 %v5750_v44, %v2749_v3  ;;  %2819 = vadd.xlane.f32.xlu0 %v2818_v49  ;;  %v2815_v11 = vsel %vm656_vm1, %v2779_v7, 0.0  ;;  %v4831_v3 = vld [vmem:[%s5027_s24 + $0x8] sm:$0xff]  ;;  %v4832_v49 = vld [vmem:[%s5027_s24 + $0x10] sm:$0xff] }
 0x699   : > { %2816 = vadd.xlane.f32.xlu1 %v2815_v11  ;;  %v2782_v25 = vmul.f32 %v5839_v36, %v5839_v36  ;;  %v3642_v7 = vsub.f32 1.0, %v4831_v3  ;;  %v3643_v11 = vsub.f32 1.0, %v4832_v49  ;;  %v4840_v3 = vld [vmem:[%s5027_s24 + $0x50] sm:$0xff]  ;;  %v4841_v49 = vld [vmem:[%s5027_s24 + $0x58] sm:$0xff] }
 0x69a   : > { %v2781_v26 = vmul.f32 %v5843_v29, %v5843_v29 }
 0x69b   : > { %v2824_v53 = vsel %vm656_vm1, %v2782_v25, 0.0  ;;  %v4833_v25 = vld [vmem:[%s5027_s24 + $0x18] sm:$0xff] }
 0x69c   : > { %2825 = vadd.xlane.f32.xlu0 %v2824_v53  ;;  %v2821_v10 = vsel %vm656_vm1, %v2781_v26, 0.0  ;;  %v3644_v26 = vsub.f32 1.0, %v4833_v25  ;;  %v4834_v53 = vld [vmem:[%s5027_s24 + $0x20] sm:$0xff] }
 0x69d   : > { %2822 = vadd.xlane.f32.xlu1 %v2821_v10  ;;  %v3645_v10 = vsub.f32 1.0, %v4834_v53 }
 0x6c0   : > { %v2735_v56 = vpop.xlane.xlu0 %2734 }
 0x6c1   : > { %v2752_v44 = vmul.f32 0.0625, %v2735_v56  ;;  %v2732_v39 = vpop.xlane.xlu1 %2731  ;;  %v4836_v56 = vld [vmem:[%s5027_s24 + $0x30] sm:$0xff] }
 0x6c2   : > { %v2751_v48 = vmul.f32 0.0625, %v2732_v39 }
 0x6c3   : > { %v5853_v21 = vsub.f32 %v5759_v12, %v2752_v44  ;;  %v4692_v12 = vpack.i.bf16 %v5640_v43, %v5635_v23  ;;  %v4835_v23 = vld [vmem:[%s5027_s24 + $0x28] sm:$0xff]  ;;  %v3647_v44 = vsub.f32 1.0, %v4836_v56 }
 0x6c4   : > { %v5856_v54 = vsub.f32 %v5762_v4, %v2751_v48  ;;  %v4830_v4 = vld [vmem:[%s5027_s24] sm:$0xff]  ;;  %v3646_v43 = vsub.f32 1.0, %v4835_v23 }
 0x6c5   : > { %v2784_v58 = vmul.f32 %v5853_v21, %v5853_v21  ;;  %v3641_v35 = vsub.f32 1.0, %v4830_v4  ;;  %v4839_v4 = vld [vmem:[%s5027_s24 + $0x48] sm:$0xff] }
 0x6c6   : > { %v2783_v51 = vmul.f32 %v5856_v54, %v5856_v54 }
 0x6c7   : > { %v2830_v47 = vsel %vm656_vm1, %v2784_v58, 0.0 }
 0x6c8   : > { %2831 = vadd.xlane.f32.xlu0 %v2830_v47  ;;  %v2827_v34 = vsel %vm656_vm1, %v2783_v51, 0.0  ;;  %v4837_v51 = vld [vmem:[%s5027_s24 + $0x38] sm:$0xff] }
 0x6c9   : > { %2828 = vadd.xlane.f32.xlu1 %v2827_v34  ;;  %v3648_v47 = vsub.f32 1.0, %v4837_v51  ;;  %v4838_v34 = vld [vmem:[%s5027_s24 + $0x40] sm:$0xff] }
 0x6da   : > { %4693 = vrot.lane.b32.xlu1 %v4692_v12, %s4911_s12 }
 0x6de   : > { %4698 = vrot.lane.b32.xlu0 %v4692_v12, %s4912_s13  ;;  %3659 = vperm.xlu1 %4611, %v3641_v35   ;;  %v3649_v12 = vsub.f32 1.0, %v4838_v34  ;;  %v3650_v35 = vsub.f32 1.0, %v4839_v4 }
 0x6e2   : > { %3664 = vperm.xlu0 %4610, %v3642_v7   ;;  %3669 = vperm.xlu1 %4611, %v3643_v11   ;;  %v3651_v7 = vsub.f32 1.0, %v4840_v3  ;;  %v3652_v11 = vsub.f32 1.0, %v4841_v49 }
 0x6e5   : > { %v2790_v23 = vpop.xlane.xlu0 %2789 }
 0x6e6   : > { %3679 = vperm.xlu0 %4610, %v3645_v10   ;;  %3674 = vperm.xlu1 %4611, %v3644_v26   ;;  %v2787_v39 = vpop.xlane.xlu1 %2786  ;;  %v2834_v51 = vmul.f32 0.0625, %v2790_v23 }
 0x6e7   : > { %v2833_v48 = vmul.f32 0.0625, %v2787_v39 }
 0x6e9   : > { %v2849_v58 = vadd.f32 1e-05, %v2833_v48 }
 0x6ea   : > { %3689 = vperm.xlu0 %4610, %v3647_v44   ;;  %3684 = vperm.xlu1 %4611, %v3646_v43  }
 0x6eb   : > { %4766 = vrsqrt.f32 %v2849_v58 }
 0x6ee   : > { %3699 = vperm.xlu0 %4610, %v3649_v12   ;;  %3694 = vperm.xlu1 %4611, %v3648_v47   ;;  %v2850_v12 = vadd.f32 1e-05, %v2834_v51 }
 0x6f0   : > { %4768 = vrsqrt.f32 %v2850_v12 }
 0x6f1   : > { %v2793_v56 = vpop.xlane.xlu1 %2792 }
 0x6f2   : > { %3709 = vperm.xlu0 %4610, %v3651_v7   ;;  %3704 = vperm.xlu1 %4611, %v3650_v35   ;;  %v2835_v47 = vmul.f32 0.0625, %v2793_v56 }
 0x6f4   : > { %v2851_v35 = vadd.f32 1e-05, %v2835_v47 }
 0x6f5   : > { %v4767_v25 = vpop.eup %4766  ;;  %v2796_v43 = vpop.xlane.xlu0 %2795 }
 0x6f6   : > { %3714 = vperm.xlu1 %4611, %v3652_v11   ;;  %v2881_v26 = vmul.f32 %v4767_v25, %v5772_v37  ;;  %v2799_v39 = vpop.xlane.xlu1 %2798  ;;  %v2836_v37 = vmul.f32 0.0625, %v2796_v43  ;;  %4770 = vrsqrt.f32 %v2851_v35 }
 0x6f7   : > { %v2837_v3 = vmul.f32 0.0625, %v2799_v39 }
 0x6f8   : > { %v2901_v53 = vmul.f32 %v5044_v13, %v2881_v26  ;;  %v2852_v7 = vadd.f32 1e-05, %v2836_v37 }
 0x6f9   : > { %v2802_v44 = vpop.xlane.xlu0 %2801  ;;  %v2853_v26 = vadd.f32 1e-05, %v2837_v3 }
 0x6fa   : > { %v5883_v10 = vadd.f32 %v5047_v14, %v2901_v53  ;;  %v2838_v11 = vmul.f32 0.0625, %v2802_v44  ;;  %4772 = vrsqrt.f32 %v2852_v7  ;;  %v4769_v43 = vpop.eup %4768 }
 0x6fb   : > { %4774 = vrsqrt.f32 %v2853_v26 }
 0x6fc   : > { %4418 = vmatprep.mubr.msk.f32.mxu0 %vm656_vm1, %v5883_v10  ;;  %v2854_v55 = vadd.f32 1e-05, %v2838_v11 }
 0x6fe   : > { %4776 = vrsqrt.f32 %v2854_v55 }
 0x700   : > { %v4771_v35 = vpop.eup %4770 }
 0x704   : > { %v4773_v3 = vpop.eup %4772 }
 0x71d   : > { %v2808_v48 = vpop.xlane.xlu0 %2807 }
 0x71e   : > { %v2805_v58 = vpop.xlane.xlu1 %2804  ;;  %v2840_v61 = vmul.f32 0.0625, %v2808_v48 }
 0x71f   : > { %v2839_v53 = vmul.f32 0.0625, %v2805_v58  ;;  %v2882_v58 = vmul.f32 %v4769_v43, %v5769_v9  ;;  %v2884_v9 = vmul.f32 %v4773_v3, %v5786_v8 }
 0x720   : > { %v2856_v47 = vadd.f32 1e-05, %v2840_v61 }
 0x721   : > { %v2814_v34 = vpop.xlane.xlu0 %2813  ;;  %v2855_v23 = vadd.f32 1e-05, %v2839_v53 }
 0x722   : > { %v2811_v4 = vpop.xlane.xlu1 %2810  ;;  %v2842_v39 = vmul.f32 0.0625, %v2814_v34  ;;  %v2883_v34 = vmul.f32 %v4771_v35, %v5781_v60 }
 0x723   : > { %v2841_v56 = vmul.f32 0.0625, %v2811_v4  ;;  %4778 = vrsqrt.f32 %v2855_v23  ;;  %v4775_v23 = vpop.eup %4774 }
 0x724   : > { %4780 = vrsqrt.f32 %v2856_v47  ;;  %v2858_v48 = vadd.f32 1e-05, %v2842_v39  ;;  %v2885_v60 = vmul.f32 %v4775_v23, %v5790_v19 }
 0x725   : > { %v2820_v49 = vpop.xlane.xlu0 %2819  ;;  %v2857_v12 = vadd.f32 1e-05, %v2841_v56 }
 0x726   : > { %v2817_v25 = vpop.xlane.xlu1 %2816  ;;  %v2844_v7 = vmul.f32 0.0625, %v2820_v49 }
 0x727   : > { %v2843_v37 = vmul.f32 0.0625, %v2817_v25  ;;  %4782 = vrsqrt.f32 %v2857_v12  ;;  %v2902_v25 = vmul.f32 %v5044_v13, %v2882_v58 }
 0x728   : > { %4784 = vrsqrt.f32 %v2858_v48  ;;  %v2860_v43 = vadd.f32 1e-05, %v2844_v7  ;;  %v2905_v7 = vmul.f32 %v5044_v13, %v2885_v60 }
 0x729   : > { %v2826_v27 = vpop.xlane.xlu0 %2825  ;;  %v2859_v4 = vadd.f32 1e-05, %v2843_v37  ;;  %v4777_v37 = vpop.eup %4776  ;;  %v5894_v58 = vadd.f32 %v5047_v14, %v2902_v25 }
 0x72a   : > { %v2823_v51 = vpop.xlane.xlu1 %2822  ;;  %v2846_v47 = vmul.f32 0.0625, %v2826_v27 }
 0x72b   : > { %v2845_v11 = vmul.f32 0.0625, %v2823_v51  ;;  %4786 = vrsqrt.f32 %v2859_v4 }
 0x72c   : > { %4788 = vrsqrt.f32 %v2860_v43  ;;  %v2862_v8 = vadd.f32 1e-05, %v2846_v47 }
 0x72d   : > { %v2861_v39 = vadd.f32 1e-05, %v2845_v11  ;;  %v4779_v35 = vpop.eup %4778 }
 0x72e   : > { %v4781_v48 = vpop.eup %4780  ;;  %v2887_v4 = vmul.f32 %v4779_v35, %v5808_v62  ;;  %v5913_v62 = vadd.f32 %v5047_v14, %v2905_v7 }
 0x72f   : > { %4790 = vrsqrt.f32 %v2861_v39 }
 0x730   : > { %4792 = vrsqrt.f32 %v2862_v8 }
 0x731   : > { %v4783_v11 = vpop.eup %4782 }
 0x732   : > { %v2889_v23 = vmul.f32 %v4783_v11, %v5819_v46 }
 0x734   : > { %v2909_v46 = vmul.f32 %v5044_v13, %v2889_v23 }
 0x755   : > { %v2832_v44 = vpop.xlane.xlu0 %2831 }
 0x756   : > { %v2829_v42 = vpop.xlane.xlu1 %2828  ;;  %v2848_v27 = vmul.f32 0.0625, %v2832_v44 }
 0x757   : > { %v2847_v51 = vmul.f32 0.0625, %v2829_v42  ;;  %v2886_v42 = vmul.f32 %v4777_v37, %v5797_v57 }
 0x758   : > { %v2864_v44 = vadd.f32 1e-05, %v2848_v27 }
 0x759   : > { %v4699_v26 = vpop.permute.xlu0 %4698  ;;  %v2863_v3 = vadd.f32 1e-05, %v2847_v51 }
 0x75a   : > { %v4694_v53 = vpop.permute.xlu1 %4693  ;;  %v4701_v55 = vunpack.i.h.bf16 %v4699_v26  ;;  %v4700_v61 = vunpack.i.l.bf16 %v4699_v26  ;;  %v2903_v26 = vmul.f32 %v5044_v13, %v2883_v34  ;;  %v2907_v34 = vmul.f32 %v5044_v13, %v2887_v4 }
 0x75b   : > { %v4696_v56 = vunpack.i.h.bf16 %v4694_v53  ;;  %v4695_v5 = vunpack.i.l.bf16 %v4694_v53  ;;  %4794 = vrsqrt.f32 %v2863_v3  ;;  %v2906_v53 = vmul.f32 %v5044_v13, %v2886_v42 }
 0x75c   : > { %v4562_v49 = vpack.c.bf16 %v4701_v55, %v4700_v61  ;;  %v5899_v19 = vadd.f32 %v5047_v14, %v2903_v26  ;;  %v2888_v55 = vmul.f32 %v4781_v48, %v5805_v28  ;;  %v4785_v61 = vpop.eup %4784  ;;  %4796 = vrsqrt.f32 %v2864_v44 }
 0x75d   : > { %v4558_v12 = vpack.c.bf16 %v4696_v56, %v4695_v5  ;;  %v2904_v5 = vmul.f32 %v5044_v13, %v2884_v9  ;;  %v4787_v25 = vpop.eup %4786  ;;  %v5922_v56 = vadd.f32 %v5047_v14, %v2906_v53  ;;  %v2890_v9 = vmul.f32 %v4785_v61, %v5815_v40 }
 0x75e   : > { %4563 = vmatprep.subr.bf16.mxu1 %v4562_v49  ;;  %v2908_v28 = vmul.f32 %v5044_v13, %v2888_v55  ;;  %v4789_v43 = vpop.eup %4788  ;;  %v5927_v47 = vadd.f32 %v5047_v14, %v2907_v34  ;;  %v5941_v26 = vadd.f32 %v5047_v14, %v2909_v46 }
 0x75f   : > { %4559 = vmatprep.subr.bf16.mxu0 %v4558_v12  ;;  %4565 = vmatpush3.bf16.msra.mxu1 %v4562_v49  ;;  %v5908_v57 = vadd.f32 %v5047_v14, %v2904_v5  ;;  %v2891_v49 = vmul.f32 %v4787_v25, %v5831_v33  ;;  %v4791_v39 = vpop.eup %4790  ;;  %v2910_v40 = vmul.f32 %v5044_v13, %v2890_v9 }
 0x760   : > { %4561 = vmatpush3.bf16.msra.mxu0 %v4558_v12  ;;  %v5936_v51 = vadd.f32 %v5047_v14, %v2908_v28  ;;  %v2892_v12 = vmul.f32 %v4789_v43, %v5827_v0  ;;  %v4793_v37 = vpop.eup %4792  ;;  %v2893_v60 = vmul.f32 %v4791_v39, %v5843_v29 }
 0x761   : > { %v2911_v33 = vmul.f32 %v5044_v13, %v2891_v49  ;;  %v5950_v8 = vadd.f32 %v5047_v14, %v2910_v40  ;;  %v2894_v27 = vmul.f32 %v4793_v37, %v5839_v36 }
 0x762   : > { %v2912_v0 = vmul.f32 %v5044_v13, %v2892_v12  ;;  %v2913_v29 = vmul.f32 %v5044_v13, %v2893_v60 }
 0x763   : > { %4419 = vmatmul.mubr.msk.f32.vlgmr.msra.gmra.mrb[36].mxu0 %vm656_vm1, %v5894_v58  ;;  %v5955_v5 = vadd.f32 %v5047_v14, %v2911_v33  ;;  %v2914_v7 = vmul.f32 %v5044_v13, %v2894_v27 }
 0x764   : > { %4421 = vmatprep.mubr.msk.f32.mxu0 %vm656_vm1, %v5899_v19  ;;  %v5964_v48 = vadd.f32 %v5047_v14, %v2912_v0  ;;  %v5969_v4 = vadd.f32 %v5047_v14, %v2913_v29 }
 0x765   : > { %v4795_v35 = vpop.eup %4794 }
 0x766   : > { %v4797_v3 = vpop.eup %4796  ;;  %v2895_v42 = vmul.f32 %v4795_v35, %v5856_v54  ;;  %v5977_v54 = vadd.f32 %v5047_v14, %v2914_v7 }
 0x767   : > { %4422 = vmatmul.mubr.msk.f32.gmra.mrb[38].mxu0 %vm656_vm1, %v5908_v57  ;;  %v2896_v36 = vmul.f32 %v4797_v3, %v5853_v21 }
 0x768   : > { %4424 = vmatprep.mubr.msk.f32.mxu0 %vm656_vm1, %v5913_v62  ;;  %v2915_v11 = vmul.f32 %v5044_v13, %v2895_v42 }
 0x769   : > { %v2916_v44 = vmul.f32 %v5044_v13, %v2896_v36 }
 0x76a   : > { %v5981_v53 = vadd.f32 %v5047_v14, %v2915_v11 }
 0x76b   : > { %4425 = vmatmul.mubr.msk.f32.gmra.mrb[40].mxu0 %vm656_vm1, %v5922_v56  ;;  %v5988_v21 = vadd.f32 %v5047_v14, %v2916_v44 }
 0x76c   : > { %4427 = vmatprep.mubr.msk.f32.mxu0 %vm656_vm1, %v5927_v47 }
 0x76f   : > { %4428 = vmatmul.mubr.msk.f32.gmra.mrb[42].mxu0 %vm656_vm1, %v5936_v51 }
 0x770   : > { %4430 = vmatprep.mubr.msk.f32.mxu0 %vm656_vm1, %v5941_v26 }
 0x773   : > { %4431 = vmatmul.mubr.msk.f32.gmra.mrb[44].mxu0 %vm656_vm1, %v5950_v8 }
 0x774   : > { %4433 = vmatprep.mubr.msk.f32.mxu0 %vm656_vm1, %v5955_v5 }
 0x777   : > { %4434 = vmatmul.mubr.msk.f32.gmra.mrb[46].mxu0 %vm656_vm1, %v5964_v48 }
 0x778   : > { %4436 = vmatprep.mubr.msk.f32.mxu0 %vm656_vm1, %v5969_v4 }
 0x77b   : > { %4437 = vmatmul.mubr.msk.f32.gmra.mrb[48].mxu0 %vm656_vm1, %v5977_v54 }
 0x77c   : > { %4439 = vmatprep.mubr.msk.f32.mxu0 %vm656_vm1, %v5981_v53 }
 0x77f   : > { %4440 = vmatmul.mubr.msk.f32.gmra.mrb[50].mxu0 %vm656_vm1, %v5988_v21 }
 0x836   : > { %v4420_v55 = vpop.f32.mrb[36].mxu0 }
 0x837   : > { %v3069_v61 = vadd.f32 %v4420_v55, %v5050_v15  ;;  %v3063_v34 = vpop.f32.mrb[37].mxu0 }
 0x838   : > { %v3064_v13 = vadd.f32 %v3063_v34, %v5050_v15 }
 0x839   : > { %v3143_v28 = vmax.f32 %v3069_v61, 0.0 }
 0x83a   : > { %v3142_v23 = vmax.f32 %v3064_v13, 0.0  ;;  %v4423_v25 = vpop.f32.mrb[38].mxu0 }
 0x83b   : > { %v3079_v9 = vadd.f32 %v4423_v25, %v5050_v15  ;;  %v3073_v43 = vpop.f32.mrb[39].mxu0 }
 0x83c   : > { %v3074_v46 = vadd.f32 %v3073_v43, %v5050_v15  ;;  %4446 = vmatprep.mubr.msk.f32.mxu1 %vm656_vm1, %v3142_v23 }
 0x83d   : > { %4447 = vmatmul.mubr.msk.f32.vlgmr.msra.gmra.mrb[28].mxu1 %vm656_vm1, %v3143_v28  ;;  %v3145_v39 = vmax.f32 %v3079_v9, 0.0 }
 0x83e   : > { %v3144_v14 = vmax.f32 %v3074_v46, 0.0  ;;  %v4426_v49 = vpop.f32.mrb[40].mxu0 }
 0x83f   : > { %v3089_v40 = vadd.f32 %v4426_v49, %v5050_v15  ;;  %v3083_v12 = vpop.f32.mrb[41].mxu0 }
 0x840   : > { %v3084_v37 = vadd.f32 %v3083_v12, %v5050_v15  ;;  %4449 = vmatprep.mubr.msk.f32.mxu1 %vm656_vm1, %v3144_v14 }
 0x841   : > { %4450 = vmatmul.mubr.msk.f32.gmra.mrb[30].mxu1 %vm656_vm1, %v3145_v39  ;;  %v3147_v35 = vmax.f32 %v3089_v40, 0.0 }
 0x842   : > { %v3146_v33 = vmax.f32 %v3084_v37, 0.0  ;;  %v4429_v60 = vpop.f32.mrb[42].mxu0 }
 0x843   : > { %v3099_v0 = vadd.f32 %v4429_v60, %v5050_v15  ;;  %v3093_v27 = vpop.f32.mrb[43].mxu0 }
 0x844   : > { %v3094_v3 = vadd.f32 %v3093_v27, %v5050_v15  ;;  %4452 = vmatprep.mubr.msk.f32.mxu1 %vm656_vm1, %v3146_v33 }
 0x845   : > { %4453 = vmatmul.mubr.msk.f32.gmra.mrb[32].mxu1 %vm656_vm1, %v3147_v35  ;;  %v3149_v7 = vmax.f32 %v3099_v0, 0.0 }
 0x846   : > { %v3148_v29 = vmax.f32 %v3094_v3, 0.0  ;;  %v4432_v42 = vpop.f32.mrb[44].mxu0 }
 0x847   : > { %v3109_v36 = vadd.f32 %v4432_v42, %v5050_v15  ;;  %v3103_v11 = vpop.f32.mrb[45].mxu0 }
 0x848   : > { %v3104_v44 = vadd.f32 %v3103_v11, %v5050_v15  ;;  %4455 = vmatprep.mubr.msk.f32.mxu1 %vm656_vm1, %v3148_v29 }
 0x849   : > { %4456 = vmatmul.mubr.msk.f32.gmra.mrb[34].mxu1 %vm656_vm1, %v3149_v7  ;;  %v3151_v34 = vmax.f32 %v3109_v36, 0.0 }
 0x84a   : > { %v3150_v55 = vmax.f32 %v3104_v44, 0.0  ;;  %v4435_v61 = vpop.f32.mrb[46].mxu0 }
 0x84b   : > { %v3119_v13 = vadd.f32 %v4435_v61, %v5050_v15  ;;  %v3113_v23 = vpop.f32.mrb[47].mxu0 }
 0x84c   : > { %v3114_v25 = vadd.f32 %v3113_v23, %v5050_v15  ;;  %4458 = vmatprep.mubr.msk.f32.mxu1 %vm656_vm1, %v3150_v55 }
 0x84d   : > { %4459 = vmatmul.mubr.msk.f32.gmra.mrb[36].mxu1 %vm656_vm1, %v3151_v34  ;;  %v3153_v43 = vmax.f32 %v3119_v13, 0.0 }
 0x84e   : > { %v3152_v28 = vmax.f32 %v3114_v25, 0.0  ;;  %v4438_v9 = vpop.f32.mrb[48].mxu0 }
 0x84f   : > { %v3129_v46 = vadd.f32 %v4438_v9, %v5050_v15  ;;  %v3123_v14 = vpop.f32.mrb[49].mxu0 }
 0x850   : > { %v3124_v49 = vadd.f32 %v3123_v14, %v5050_v15  ;;  %4461 = vmatprep.mubr.msk.f32.mxu1 %vm656_vm1, %v3152_v28 }
 0x851   : > { %4462 = vmatmul.mubr.msk.f32.gmra.mrb[38].mxu1 %vm656_vm1, %v3153_v43  ;;  %v3155_v12 = vmax.f32 %v3129_v46, 0.0 }
 0x852   : > { %v3154_v39 = vmax.f32 %v3124_v49, 0.0  ;;  %v4441_v40 = vpop.f32.mrb[50].mxu0 }
 0x853   : > { %v3139_v37 = vadd.f32 %v4441_v40, %v5050_v15  ;;  %v3133_v33 = vpop.f32.mrb[51].mxu0 }
 0x854   : > { %v3134_v60 = vadd.f32 %v3133_v33, %v5050_v15  ;;  %4464 = vmatprep.mubr.msk.f32.mxu1 %vm656_vm1, %v3154_v39 }
 0x855   : > { %4465 = vmatmul.mubr.msk.f32.gmra.mrb[40].mxu1 %vm656_vm1, %v3155_v12  ;;  %v3157_v0 = vmax.f32 %v3139_v37, 0.0 }
 0x856   : > { %v3156_v35 = vmax.f32 %v3134_v60, 0.0 }
 0x858   : > { %4467 = vmatprep.mubr.msk.f32.mxu1 %vm656_vm1, %v3156_v35 }
 0x859   : > { %4468 = vmatmul.mubr.msk.f32.gmra.mrb[42].mxu1 %vm656_vm1, %v3157_v0 }
 0x910   : > { %v4448_v27 = vpop.f32.mrb[28].mxu1 }
 0x911   : > { %v3288_v3 = vadd.f32 %v4448_v27, %v5053_v16  ;;  %v3282_v29 = vpop.f32.mrb[29].mxu1 }
 0x912   : > { %v3283_v42 = vadd.f32 %v3282_v29, %v5053_v16 }
 0x913   : > { %v6027_v7 = vadd.f32 %v3288_v3, %v5894_v58 }
 0x914   : > { %v6030_v15 = vadd.f32 %v3283_v42, %v5883_v10  ;;  %v4451_v36 = vpop.f32.mrb[30].mxu1 }
 0x915   : > { %v3298_v11 = vadd.f32 %v4451_v36, %v5053_v16  ;;  %v3292_v44 = vpop.f32.mrb[31].mxu1  ;;  %v3380_v55 = vsel %vm656_vm1, %v6027_v7, 0.0 }
 0x916   : > { %v3293_v61 = vadd.f32 %v3292_v44, %v5053_v16  ;;  %3381 = vadd.xlane.f32.xlu0 %v3380_v55  ;;  %v3377_v34 = vsel %vm656_vm1, %v6030_v15, 0.0 }
 0x917   : > { %v6039_v13 = vadd.f32 %v3298_v11, %v5908_v57  ;;  %3378 = vadd.xlane.f32.xlu1 %v3377_v34 }
 0x918   : > { %v6042_v10 = vadd.f32 %v3293_v61, %v5899_v19  ;;  %v4454_v58 = vpop.f32.mrb[32].mxu1 }
 0x919   : > { %v3308_v23 = vadd.f32 %v4454_v58, %v5053_v16  ;;  %v3302_v25 = vpop.f32.mrb[33].mxu1  ;;  %v3386_v28 = vsel %vm656_vm1, %v6039_v13, 0.0 }
 0x91a   : > { %v3303_v9 = vadd.f32 %v3302_v25, %v5053_v16  ;;  %3387 = vadd.xlane.f32.xlu0 %v3386_v28  ;;  %v3383_v43 = vsel %vm656_vm1, %v6042_v10, 0.0 }
 0x91b   : > { %v6051_v57 = vadd.f32 %v3308_v23, %v5922_v56  ;;  %3384 = vadd.xlane.f32.xlu1 %v3383_v43 }
 0x91c   : > { %v6054_v19 = vadd.f32 %v3303_v9, %v5913_v62  ;;  %v4457_v46 = vpop.f32.mrb[34].mxu1 }
 0x91d   : > { %v3318_v14 = vadd.f32 %v4457_v46, %v5053_v16  ;;  %v3312_v49 = vpop.f32.mrb[35].mxu1  ;;  %v3392_v39 = vsel %vm656_vm1, %v6051_v57, 0.0 }
 0x91e   : > { %v3313_v40 = vadd.f32 %v3312_v49, %v5053_v16  ;;  %3393 = vadd.xlane.f32.xlu0 %v3392_v39  ;;  %v3389_v12 = vsel %vm656_vm1, %v6054_v19, 0.0 }
 0x91f   : > { %v6063_v56 = vadd.f32 %v3318_v14, %v5936_v51  ;;  %3390 = vadd.xlane.f32.xlu1 %v3389_v12 }
 0x920   : > { %v6066_v62 = vadd.f32 %v3313_v40, %v5927_v47  ;;  %v4460_v37 = vpop.f32.mrb[36].mxu1 }
 0x921   : > { %v3328_v33 = vadd.f32 %v4460_v37, %v5053_v16  ;;  %v3322_v60 = vpop.f32.mrb[37].mxu1  ;;  %v3398_v35 = vsel %vm656_vm1, %v6063_v56, 0.0  ;;  %v4843_v37 = vld [vmem:[%s5027_s24 + $0x60] sm:$0xff] }
 0x922   : > { %v3323_v0 = vadd.f32 %v3322_v60, %v5053_v16  ;;  %3399 = vadd.xlane.f32.xlu0 %v3398_v35  ;;  %v3395_v27 = vsel %vm656_vm1, %v6066_v62, 0.0 }
 0x923   : > { %v6075_v51 = vadd.f32 %v3328_v33, %v5950_v8  ;;  %3396 = vadd.xlane.f32.xlu1 %v3395_v27  ;;  %v3653_v33 = vsub.f32 1.0, %v4843_v37 }
 0x924   : > { %v6078_v47 = vadd.f32 %v3323_v0, %v5941_v26  ;;  %v4463_v3 = vpop.f32.mrb[38].mxu1 }
 0x925   : > { %v3338_v29 = vadd.f32 %v4463_v3, %v5053_v16  ;;  %v3332_v42 = vpop.f32.mrb[39].mxu1  ;;  %v3404_v36 = vsel %vm656_vm1, %v6075_v51, 0.0 }
 0x926   : > { %v3333_v11 = vadd.f32 %v3332_v42, %v5053_v16  ;;  %3405 = vadd.xlane.f32.xlu0 %v3404_v36  ;;  %v3401_v44 = vsel %vm656_vm1, %v6078_v47, 0.0 }
 0x927   : > { %v6087_v8 = vadd.f32 %v3338_v29, %v5964_v48  ;;  %3402 = vadd.xlane.f32.xlu1 %v3401_v44 }
 0x928   : > { %v6090_v26 = vadd.f32 %v3333_v11, %v5955_v5  ;;  %v4466_v55 = vpop.f32.mrb[40].mxu1 }
 0x929   : > { %v3348_v61 = vadd.f32 %v4466_v55, %v5053_v16  ;;  %v3342_v34 = vpop.f32.mrb[41].mxu1  ;;  %v3410_v58 = vsel %vm656_vm1, %v6087_v8, 0.0 }
 0x92a   : > { %v3343_v23 = vadd.f32 %v3342_v34, %v5053_v16  ;;  %3411 = vadd.xlane.f32.xlu0 %v3410_v58  ;;  %v3407_v25 = vsel %vm656_vm1, %v6090_v26, 0.0 }
 0x92b   : > { %v6099_v48 = vadd.f32 %v3348_v61, %v5977_v54  ;;  %3408 = vadd.xlane.f32.xlu1 %v3407_v25 }
 0x92c   : > { %v6102_v5 = vadd.f32 %v3343_v23, %v5969_v4  ;;  %v4469_v28 = vpop.f32.mrb[42].mxu1 }
 0x92d   : > { %v3358_v9 = vadd.f32 %v4469_v28, %v5053_v16  ;;  %v3352_v43 = vpop.f32.mrb[43].mxu1  ;;  %v3416_v46 = vsel %vm656_vm1, %v6099_v48, 0.0 }
 0x92e   : > { %v3353_v14 = vadd.f32 %v3352_v43, %v5053_v16  ;;  %3417 = vadd.xlane.f32.xlu0 %v3416_v46  ;;  %v3413_v54 = vsel %vm656_vm1, %v6102_v5, 0.0  ;;  %v4842_v16 = vld [vmem:[%s5027_s24 + $0x68] sm:$0xff] }
 0x92f   : > { %v6111_v49 = vadd.f32 %v3358_v9, %v5988_v21  ;;  %3414 = vadd.xlane.f32.xlu1 %v3413_v54  ;;  %v3654_v12 = vsub.f32 1.0, %v4842_v16  ;;  %v6122_v21 = vpop.permute.xlu1 %3659 }
 0x930   : > { %v6114_v4 = vadd.f32 %v3353_v14, %v5981_v53  ;;  %v6126_v53 = vpop.permute.xlu0 %3664 }
 0x931   : > { %v3422_v39 = vsel %vm656_vm1, %v6111_v49, 0.0 }
 0x932   : > { %3423 = vadd.xlane.f32.xlu0 %v3422_v39  ;;  %v3419_v40 = vsel %vm656_vm1, %v6114_v4, 0.0 }
 0x933   : > { %3420 = vadd.xlane.f32.xlu1 %v3419_v40  ;;  %v6124_v60 = vpop.permute.xlu1 %3669 }
 0x934   : > { %v6130_v0 = vpop.permute.xlu0 %3679 }
 0x937   : > { %v6128_v35 = vpop.permute.xlu1 %3674 }
 0x938   : > { %v6134_v3 = vpop.permute.xlu0 %3689 }
 0x93b   : > { %v6132_v27 = vpop.permute.xlu1 %3684 }
 0x93c   : > { %v6138_v42 = vpop.permute.xlu0 %3699 }
 0x93f   : > { %v6136_v29 = vpop.permute.xlu1 %3694 }
 0x940   : > { %v6142_v11 = vpop.permute.xlu0 %3709 }
 0x943   : > { %v6140_v36 = vpop.permute.xlu1 %3704 }
 0x944   : > { %3724 = vperm.xlu1 %4611, %v3654_v12  }
 0x947   : > { %v6144_v44 = vpop.permute.xlu1 %3714 }
 0x948   : > { %3719 = vperm.xlu0 %4610, %v3653_v33  }
 0x9a3   : > { %v3382_v55 = vpop.xlane.xlu0 %3381 }
 0x9a4   : > { %v3426_v61 = vmul.f32 0.0625, %v3382_v55  ;;  %v3379_v34 = vpop.xlane.xlu1 %3378 }
 0x9a5   : > { %v3425_v58 = vmul.f32 0.0625, %v3379_v34 }
 0x9a6   : > { %v6147_v23 = vsub.f32 %v6027_v7, %v3426_v61 }
 0x9a7   : > { %v6150_v25 = vsub.f32 %v6030_v15, %v3425_v58  ;;  %v3388_v28 = vpop.xlane.xlu0 %3387 }
 0x9a8   : > { %v3428_v9 = vmul.f32 0.0625, %v3388_v28  ;;  %v3385_v43 = vpop.xlane.xlu1 %3384  ;;  %v3458_v46 = vmul.f32 %v6147_v23, %v6147_v23 }
 0x9a9   : > { %v3427_v14 = vmul.f32 0.0625, %v3385_v43  ;;  %v3457_v54 = vmul.f32 %v6150_v25, %v6150_v25 }
 0x9aa   : > { %v6157_v39 = vsub.f32 %v6039_v13, %v3428_v9  ;;  %v3476_v40 = vsel %vm656_vm1, %v3458_v46, 0.0 }
 0x9ab   : > { %v6161_v7 = vsub.f32 %v6042_v10, %v3427_v14  ;;  %v3394_v15 = vpop.xlane.xlu0 %3393  ;;  %3477 = vadd.xlane.f32.xlu0 %v3476_v40  ;;  %v3473_v16 = vsel %vm656_vm1, %v3457_v54, 0.0 }
 0x9ac   : > { %v3430_v12 = vmul.f32 0.0625, %v3394_v15  ;;  %3474 = vadd.xlane.f32.xlu1 %v3473_v16  ;;  %v3391_v37 = vpop.xlane.xlu1 %3390  ;;  %v3460_v33 = vmul.f32 %v6157_v39, %v6157_v39 }
 0x9ad   : > { %v3429_v55 = vmul.f32 0.0625, %v3391_v37  ;;  %v3459_v13 = vmul.f32 %v6161_v7, %v6161_v7 }
 0x9ae   : > { %v6169_v61 = vsub.f32 %v6051_v57, %v3430_v12  ;;  %v3482_v10 = vsel %vm656_vm1, %v3460_v33, 0.0 }
 0x9af   : > { %v6173_v34 = vsub.f32 %v6054_v19, %v3429_v55  ;;  %v3400_v58 = vpop.xlane.xlu0 %3399  ;;  %3483 = vadd.xlane.f32.xlu0 %v3482_v10  ;;  %v3479_v28 = vsel %vm656_vm1, %v3459_v13, 0.0 }
 0x9b0   : > { %v3432_v9 = vmul.f32 0.0625, %v3400_v58  ;;  %3480 = vadd.xlane.f32.xlu1 %v3479_v28  ;;  %v3397_v43 = vpop.xlane.xlu1 %3396  ;;  %v3462_v46 = vmul.f32 %v6169_v61, %v6169_v61 }
 0x9b1   : > { %v3431_v14 = vmul.f32 0.0625, %v3397_v43  ;;  %v3461_v57 = vmul.f32 %v6173_v34, %v6173_v34 }
 0x9b2   : > { %v6181_v54 = vsub.f32 %v6063_v56, %v3432_v9  ;;  %v3488_v19 = vsel %vm656_vm1, %v3462_v46, 0.0 }
 0x9b3   : > { %v6185_v40 = vsub.f32 %v6066_v62, %v3431_v14  ;;  %v3406_v15 = vpop.xlane.xlu0 %3405  ;;  %3489 = vadd.xlane.f32.xlu0 %v3488_v19  ;;  %v3485_v16 = vsel %vm656_vm1, %v3461_v57, 0.0 }
 0x9b4   : > { %v3434_v12 = vmul.f32 0.0625, %v3406_v15  ;;  %3486 = vadd.xlane.f32.xlu1 %v3485_v16  ;;  %v3403_v37 = vpop.xlane.xlu1 %3402  ;;  %v3464_v33 = vmul.f32 %v6181_v54, %v6181_v54 }
 0x9b5   : > { %v3433_v55 = vmul.f32 0.0625, %v3403_v37  ;;  %v3463_v56 = vmul.f32 %v6185_v40, %v6185_v40 }
 0x9b6   : > { %v6193_v13 = vsub.f32 %v6075_v51, %v3434_v12  ;;  %v3494_v62 = vsel %vm656_vm1, %v3464_v33, 0.0 }
 0x9b7   : > { %v6197_v10 = vsub.f32 %v6078_v47, %v3433_v55  ;;  %v3412_v58 = vpop.xlane.xlu0 %3411  ;;  %3495 = vadd.xlane.f32.xlu0 %v3494_v62  ;;  %v3491_v28 = vsel %vm656_vm1, %v3463_v56, 0.0 }
 0x9b8   : > { %v3436_v9 = vmul.f32 0.0625, %v3412_v58  ;;  %3492 = vadd.xlane.f32.xlu1 %v3491_v28  ;;  %v3409_v43 = vpop.xlane.xlu1 %3408  ;;  %v3466_v46 = vmul.f32 %v6193_v13, %v6193_v13 }
 0x9b9   : > { %v3435_v14 = vmul.f32 0.0625, %v3409_v43  ;;  %v3465_v51 = vmul.f32 %v6197_v10, %v6197_v10 }
 0x9ba   : > { %v6205_v57 = vsub.f32 %v6087_v8, %v3436_v9  ;;  %v3500_v47 = vsel %vm656_vm1, %v3466_v46, 0.0 }
 0x9bb   : > { %v6209_v19 = vsub.f32 %v6090_v26, %v3435_v14  ;;  %v3418_v15 = vpop.xlane.xlu0 %3417  ;;  %3501 = vadd.xlane.f32.xlu0 %v3500_v47  ;;  %v3497_v16 = vsel %vm656_vm1, %v3465_v51, 0.0 }
 0x9bc   : > { %v3438_v12 = vmul.f32 0.0625, %v3418_v15  ;;  %3498 = vadd.xlane.f32.xlu1 %v3497_v16  ;;  %v3415_v37 = vpop.xlane.xlu1 %3414  ;;  %v3468_v33 = vmul.f32 %v6205_v57, %v6205_v57 }
 0x9bd   : > { %v3437_v55 = vmul.f32 0.0625, %v3415_v37  ;;  %v3467_v8 = vmul.f32 %v6209_v19, %v6209_v19 }
 0x9be   : > { %v6217_v56 = vsub.f32 %v6099_v48, %v3438_v12  ;;  %v3506_v26 = vsel %vm656_vm1, %v3468_v33, 0.0  ;;  %v4844_v33 = vld [vmem:[%s5027_s24 + $0x78] sm:$0xff] }
 0x9bf   : > { %v6221_v62 = vsub.f32 %v6102_v5, %v3437_v55  ;;  %3507 = vadd.xlane.f32.xlu0 %v3506_v26  ;;  %v3424_v58 = vpop.xlane.xlu0 %3423  ;;  %v3503_v28 = vsel %vm656_vm1, %v3467_v8, 0.0  ;;  %v3656_v55 = vsub.f32 1.0, %v4844_v33 }
 0x9c0   : > { %v3440_v9 = vmul.f32 0.0625, %v3424_v58  ;;  %3504 = vadd.xlane.f32.xlu1 %v3503_v28  ;;  %v3421_v43 = vpop.xlane.xlu1 %3420  ;;  %v3470_v46 = vmul.f32 %v6217_v56, %v6217_v56 }
 0x9c1   : > { %v3439_v14 = vmul.f32 0.0625, %v3421_v43  ;;  %v3469_v48 = vmul.f32 %v6221_v62, %v6221_v62 }
 0x9c2   : > { %v6229_v51 = vsub.f32 %v6111_v49, %v3440_v9  ;;  %v3512_v5 = vsel %vm656_vm1, %v3470_v46, 0.0 }
 0x9c3   : > { %v6233_v47 = vsub.f32 %v6114_v4, %v3439_v14  ;;  %3513 = vadd.xlane.f32.xlu0 %v3512_v5  ;;  %v3509_v15 = vsel %vm656_vm1, %v3469_v48, 0.0  ;;  %v4845_v4 = vld [vmem:[%s5027_s24 + $0x70] sm:$0xff]  ;;  %s4852_s24 = scalar_lea.vmem %s4851_s22, 256 }
 0x9c4   : > { %3510 = vadd.xlane.f32.xlu1 %v3509_v15  ;;  %v3472_v16 = vmul.f32 %v6229_v51, %v6229_v51  ;;  %v3655_v8 = vsub.f32 1.0, %v4845_v4  ;;  %v6246_v58 = vpop.permute.xlu1 %3724  ;;  %p4854_p1 = scmp.lt.s32.totalorder %s4852_s24, %s4846_s20 }
 0x9c5   : > { %v3471_v12 = vmul.f32 %v6233_v47, %v6233_v47 }
 0x9c6   : > { %v3518_v37 = vsel %vm656_vm1, %v3472_v16, 0.0  ;;  %p4855_p2 = por %p4854_p1, %p4853_p0 }
 0x9c7   : > { %3519 = vadd.xlane.f32.xlu0 %v3518_v37  ;;  %v3515_v49 = vsel %vm656_vm1, %v3471_v12, 0.0  ;;  %v6244_v26 = vpop.permute.xlu0 %3719 }
 0x9c8   : > { %3516 = vadd.xlane.f32.xlu1 %v3515_v49  ;;  %p4856_p3 = pnand %p4855_p2, %p4849_p13 }
 0x9d9   : > { %3734 = vperm.xlu1 %4611, %v3656_v55  }
 0x9dd   : > { %3729 = vperm.xlu0 %4610, %v3655_v8   ;;  %v394_v8 = vld [vmem:[%s6453_s7 + $0x8] sm:$0x3] }
 0xa38   : > { %v3478_v28 = vpop.xlane.xlu0 %3477 }
 0xa39   : > { %v3522_v9 = vmul.f32 0.0625, %v3478_v28  ;;  %v3475_v43 = vpop.xlane.xlu1 %3474 }
 0xa3a   : > { %v3521_v46 = vmul.f32 0.0625, %v3475_v43 }
 0xa3b   : > { %v3538_v14 = vadd.f32 1e-05, %v3522_v9 }
 0xa3c   : > { %v3537_v48 = vadd.f32 1e-05, %v3521_v46  ;;  %v3484_v5 = vpop.xlane.xlu0 %3483 }
 0xa3d   : > { %4798 = vrsqrt.f32 %v3538_v14  ;;  %v3524_v15 = vmul.f32 0.0625, %v3484_v5  ;;  %v3481_v16 = vpop.xlane.xlu1 %3480  ;;  %v6252_v14 = vrot.slane %v394_v8, %v5056_v17  ;;  %v6264_v17 = vmul.f32 %v5156_v31, %v5128_v6  ;;  %v6497_v6 = vld [vmem:[#allocation6_spill] sm:$0xff] }
 0xa3e   : > { %4800 = vrsqrt.f32 %v3537_v48  ;;  %v3523_v12 = vmul.f32 0.0625, %v3481_v16  ;;  %v6281_v31 = vmul.f32 %v5200_v1, %v6497_v6  ;;  %v6500_v1 = vld [vmem:[#allocation9_spill] sm:$0xff] }
 0xa3f   : > { %v3540_v37 = vadd.f32 1e-05, %v3524_v15  ;;  %v6495_v15 = vsub.s32 1, %v5008_v2 }
 0xa40   : > { %v3539_v49 = vadd.f32 1e-05, %v3523_v12  ;;  %v3490_v33 = vpop.xlane.xlu0 %3489  ;;  %v3626_v12 = vmul.f32 %v5138_v20, %v5110_v59  ;;  %v6496_v59 = vld [vmem:[#allocation5_spill] sm:$0xff] }
 0xa41   : > { %4802 = vrsqrt.f32 %v3540_v37  ;;  %v3526_v55 = vmul.f32 0.0625, %v3490_v33  ;;  %v3487_v4 = vpop.xlane.xlu1 %3486  ;;  %v6256_v16 = vrot.slane %v394_v8, %v6495_v15  ;;  %v3625_v33 = vmul.f32 %v5141_v22, %v5121_v63 }
 0xa42   : > { %4804 = vrsqrt.f32 %v3539_v49  ;;  %v3525_v28 = vmul.f32 0.0625, %v3487_v4  ;;  %v6272_v8 = vmul.f32 %v5178_v45, %v5153_v30  ;;  %v6276_v20 = vmul.f32 %v5189_v52, %v6496_v59 }
 0xa43   : > { %v3542_v9 = vadd.f32 1e-05, %v3526_v55  ;;  %v6268_v55 = vmul.f32 %v5167_v38, %v5143_v24 }
 0xa44   : > { %v3541_v43 = vadd.f32 1e-05, %v3525_v28  ;;  %v3496_v46 = vpop.xlane.xlu0 %3495 }
 0xa45   : > { %4806 = vrsqrt.f32 %v3542_v9  ;;  %v3528_v48 = vmul.f32 0.0625, %v3496_v46  ;;  %v3493_v5 = vpop.xlane.xlu1 %3492  ;;  %v6499_v46 = vld [vmem:[#allocation8_spill] sm:$0xff] }
 0xa46   : > { %4808 = vrsqrt.f32 %v3541_v43  ;;  %v3527_v37 = vmul.f32 0.0625, %v3493_v5  ;;  %v6498_v43 = vld [vmem:[#allocation7_spill] sm:$0xff]  ;;  %v6295_v5 = vmul.f32 %v5233_v41, %v6500_v1 }
 0xa47   : > { %v4799_v49 = vpop.eup %4798  ;;  %v3544_v2 = vadd.f32 1e-05, %v3528_v48  ;;  %v6286_v30 = vmul.f32 %v5211_v18, %v6498_v43  ;;  %v6291_v48 = vmul.f32 %v5222_v32, %v6499_v46  ;;  %v6503_v43 = vld [vmem:[#allocation14_spill] sm:$0xff] }
 0xa48   : > { %v4801_v4 = vpop.eup %4800  ;;  %v3570_v63 = vmul.f32 %v4799_v49, %v6147_v23  ;;  %v3543_v22 = vadd.f32 1e-05, %v3527_v37  ;;  %v3502_v28 = vpop.xlane.xlu0 %3501  ;;  %v6501_v49 = vld [vmem:[#allocation10_spill] sm:$0xff] }
 0xa49   : > { %v3569_v24 = vmul.f32 %v4801_v4, %v6150_v25  ;;  %4810 = vrsqrt.f32 %v3544_v2  ;;  %v3530_v38 = vmul.f32 0.0625, %v3502_v28  ;;  %v3499_v9 = vpop.xlane.xlu1 %3498  ;;  %v6300_v18 = vmul.f32 %v5244_v50, %v6501_v49 }
 0xa4a   : > { %v3590_v45 = vmul.f32 %v6252_v14, %v3570_v63  ;;  %4812 = vrsqrt.f32 %v3543_v22  ;;  %v3529_v52 = vmul.f32 0.0625, %v3499_v9  ;;  %v6502_v9 = vld [vmem:[#allocation11_spill] sm:$0xff] }
 0xa4b   : > { %v4803_v23 = vpop.eup %4802  ;;  %v3589_v25 = vmul.f32 %v6252_v14, %v3569_v24  ;;  %v3546_v15 = vadd.f32 1e-05, %v3530_v38 }
 0xa4c   : > { %v4805_v37 = vpop.eup %4804  ;;  %v3610_v2 = vadd.f32 %v6256_v16, %v3590_v45  ;;  %v3572_v4 = vmul.f32 %v4803_v23, %v6157_v39  ;;  %v3545_v59 = vadd.f32 1e-05, %v3529_v52  ;;  %v3508_v63 = vpop.xlane.xlu0 %3507  ;;  %v6310_v45 = vmul.f32 %v6503_v43, %v6502_v9 }
 0xa4d   : > { %v3609_v32 = vadd.f32 %v6256_v16, %v3589_v25  ;;  %v3571_v22 = vmul.f32 %v4805_v37, %v6161_v7  ;;  %4814 = vrsqrt.f32 %v3546_v15  ;;  %v3532_v41 = vmul.f32 0.0625, %v3508_v63  ;;  %v3505_v28 = vpop.xlane.xlu1 %3504 }
 0xa4e   : > { %v3738_v6 = vmul.f32 %v6126_v53, %v3610_v2  ;;  %v3592_v24 = vmul.f32 %v6252_v14, %v3572_v4  ;;  %4816 = vrsqrt.f32 %v3545_v59  ;;  %v3531_v50 = vmul.f32 0.0625, %v3505_v28 }
 0xa4f   : > { %v4807_v38 = vpop.eup %4806  ;;  %v3737_v39 = vmul.f32 %v6122_v21, %v3609_v32  ;;  %v3591_v52 = vmul.f32 %v6252_v14, %v3571_v22  ;;  %v3548_v23 = vadd.f32 1e-05, %v3532_v41 }
 0xa50   : > { %v4809_v7 = vpop.eup %4808  ;;  %v3754_v46 = vadd.f32 %v3738_v6, %v3626_v12  ;;  %v3612_v1 = vadd.f32 %v6256_v16, %v3592_v24  ;;  %v3574_v53 = vmul.f32 %v4807_v38, %v6169_v61  ;;  %v3547_v25 = vadd.f32 1e-05, %v3531_v50  ;;  %v3514_v15 = vpop.xlane.xlu0 %3513 }
 0xa51   : > { %v3753_v37 = vadd.f32 %v3737_v39, %v3625_v33  ;;  %v3611_v49 = vadd.f32 %v6256_v16, %v3591_v52  ;;  %v3573_v2 = vmul.f32 %v4809_v7, %v6173_v34  ;;  %4818 = vrsqrt.f32 %v3548_v23 }
 0xa52   : > { %v3770_v4 = vsel %vm656_vm1, %v3754_v46, 0.0  ;;  %v3740_v21 = vmul.f32 %v6128_v35, %v3612_v1  ;;  %v3594_v59 = vmul.f32 %v6252_v14, %v3574_v53  ;;  %4820 = vrsqrt.f32 %v3547_v25 }
 0xa53   : > { %v4811_v12 = vpop.eup %4810  ;;  %v3769_v63 = vsel %vm656_vm1, %v3753_v37, 0.0  ;;  %v3739_v61 = vmul.f32 %v6124_v60, %v3611_v49  ;;  %v3593_v32 = vmul.f32 %v6252_v14, %v3573_v2  ;;  %v3534_v33 = vmul.f32 0.0625, %v3514_v15 }
 0xa54   : > { %v4813_v22 = vpop.eup %4812  ;;  %v3771_v41 = vadd.f32 %v3770_v4, %v3769_v63  ;;  %v3756_v34 = vadd.f32 %v3740_v21, %v6268_v55  ;;  %v3614_v28 = vadd.f32 %v6256_v16, %v3594_v59  ;;  %v3576_v6 = vmul.f32 %v4811_v12, %v6181_v54  ;;  %v3511_v12 = vpop.xlane.xlu1 %3510 }
 0xa55   : > { %v3755_v35 = vadd.f32 %v3739_v61, %v6264_v17  ;;  %v3613_v24 = vadd.f32 %v6256_v16, %v3593_v32  ;;  %v3575_v50 = vmul.f32 %v4813_v22, %v6185_v40  ;;  %v3550_v38 = vadd.f32 1e-05, %v3534_v33 }
 0xa56   : > { %v3772_v9 = vrot.slane %v3771_v41, 4  ;;  %v3779_v60 = vsel %vm656_vm1, %v3756_v34, 0.0  ;;  %v3742_v43 = vmul.f32 %v6132_v27, %v3614_v28  ;;  %v3596_v39 = vmul.f32 %v6252_v14, %v3576_v6 }
 0xa57   : > { %v4815_v52 = vpop.eup %4814  ;;  %v3778_v55 = vsel %vm656_vm1, %v3755_v35, 0.0  ;;  %v3741_v23 = vmul.f32 %v6130_v0, %v3613_v24  ;;  %v3595_v54 = vmul.f32 %v6252_v14, %v3575_v50  ;;  %4822 = vrsqrt.f32 %v3550_v38  ;;  %v3520_v35 = vpop.xlane.xlu0 %3519 }
 0xa58   : > { %v4817_v17 = vpop.eup %4816  ;;  %v3773_v7 = vadd.f32 %v3772_v9, %v3771_v41  ;;  %v3780_v46 = vadd.f32 %v3779_v60, %v3778_v55  ;;  %v3758_v40 = vadd.f32 %v3742_v43, %v6276_v20  ;;  %v3616_v1 = vadd.f32 %v6256_v16, %v3596_v39 }
 0xa59   : > { %v3757_v53 = vadd.f32 %v3741_v23, %v6272_v8  ;;  %v3615_v27 = vadd.f32 %v6256_v16, %v3595_v54  ;;  %v3578_v25 = vmul.f32 %v4815_v52, %v6193_v13  ;;  %v3577_v15 = vmul.f32 %v4817_v17, %v6197_v10  ;;  %v3517_v23 = vpop.xlane.xlu1 %3516 }
 0xa5a   : > { %v3774_v37 = vrot.slane %v3773_v7, 2  ;;  %v3781_v0 = vrot.slane %v3780_v46, 4  ;;  %v3788_v49 = vsel %vm656_vm1, %v3758_v40, 0.0  ;;  %v3744_v2 = vmul.f32 %v6136_v29, %v3616_v1 }
 0xa5b   : > { %v4819_v4 = vpop.eup %4818  ;;  %v3787_v21 = vsel %vm656_vm1, %v3757_v53, 0.0  ;;  %v3743_v20 = vmul.f32 %v6134_v3, %v3615_v27  ;;  %v3598_v59 = vmul.f32 %v6252_v14, %v3578_v25  ;;  %v3597_v8 = vmul.f32 %v6252_v14, %v3577_v15 }
 0xa5c   : > { %v4821_v63 = vpop.eup %4820  ;;  %v3782_v13 = vadd.f32 %v3781_v0, %v3780_v46  ;;  %v3789_v61 = vadd.f32 %v3788_v49, %v3787_v21  ;;  %v3760_v10 = vadd.f32 %v3744_v2, %v6286_v30  ;;  %v3580_v32 = vmul.f32 %v4819_v4, %v6205_v57 }
 0xa5d   : > { %v3759_v33 = vadd.f32 %v3743_v20, %v6281_v31  ;;  %v3618_v29 = vadd.f32 %v6256_v16, %v3598_v59  ;;  %v3617_v22 = vadd.f32 %v6256_v16, %v3597_v8  ;;  %v3579_v3 = vmul.f32 %v4821_v63, %v6209_v19 }
 0xa5e   : > { %v3783_v41 = vrot.slane %v3782_v13, 2  ;;  %v3790_v34 = vrot.slane %v3789_v61, 4  ;;  %v3797_v28 = vsel %vm656_vm1, %v3760_v10, 0.0  ;;  %v3600_v6 = vmul.f32 %v6252_v14, %v3580_v32 }
 0xa5f   : > { %v3796_v24 = vsel %vm656_vm1, %v3759_v33, 0.0  ;;  %v3746_v30 = vmul.f32 %v6140_v36, %v3618_v29  ;;  %v3745_v57 = vmul.f32 %v6138_v42, %v3617_v22  ;;  %v3599_v31 = vmul.f32 %v6252_v14, %v3579_v3 }
 0xa60   : > { %v3791_v50 = vadd.f32 %v3790_v34, %v3789_v61  ;;  %v3798_v38 = vadd.f32 %v3797_v28, %v3796_v24  ;;  %v3620_v9 = vadd.f32 %v6256_v16, %v3600_v6  ;;  %v3533_v19 = vmul.f32 0.0625, %v3511_v12 }
 0xa61   : > { %v4823_v60 = vpop.eup %4822  ;;  %v3762_v43 = vadd.f32 %v3746_v30, %v6295_v5  ;;  %v3761_v39 = vadd.f32 %v3745_v57, %v6291_v48  ;;  %v3619_v52 = vadd.f32 %v6256_v16, %v3599_v31  ;;  %v3536_v55 = vmul.f32 0.0625, %v3520_v35 }
 0xa62   : > { %v3799_v54 = vrot.slane %v3798_v38, 4  ;;  %v3748_v36 = vmul.f32 %v6144_v44, %v3620_v9  ;;  %v3582_v42 = vmul.f32 %v4823_v60, %v6217_v56  ;;  %v3549_v17 = vadd.f32 1e-05, %v3533_v19  ;;  %v6504_v60 = vld [vmem:[#allocation13_spill] sm:$0xff] }
 0xa63   : > { %v3806_v46 = vsel %vm656_vm1, %v3762_v43, 0.0  ;;  %v3805_v40 = vsel %vm656_vm1, %v3761_v39, 0.0  ;;  %v3747_v1 = vmul.f32 %v6142_v11, %v3619_v52  ;;  %v3552_v53 = vadd.f32 1e-05, %v3536_v55  ;;  %v6505_v43 = vld [vmem:[#allocation18_spill] sm:$0xff] }
 0xa64   : > { %v3764_v5 = vadd.f32 %v3748_v36, %v6310_v45  ;;  %v3602_v48 = vmul.f32 %v6252_v14, %v3582_v42  ;;  %4824 = vrsqrt.f32 %v3549_v17  ;;  %v3535_v27 = vmul.f32 0.0625, %v3517_v23 }
 0xa65   : > { %v3763_v25 = vadd.f32 %v3747_v1, %v6300_v18  ;;  %4826 = vrsqrt.f32 %v3552_v53  ;;  %v3775_v44 = vadd.f32 %v3774_v37, %v3773_v7  ;;  %v3784_v15 = vadd.f32 %v3783_v41, %v3782_v13  ;;  %v6506_v1 = vld [vmem:[#allocation12_spill] sm:$0xff] }
 0xa66   : > { %v3622_v56 = vadd.f32 %v6256_v16, %v3602_v48  ;;  %v3551_v0 = vadd.f32 1e-05, %v3535_v27  ;;  %v3792_v49 = vrot.slane %v3791_v50, 2  ;;  %v3800_v2 = vadd.f32 %v3799_v54, %v3798_v38  ;;  %v6507_v53 = vld [vmem:[#allocation16_spill] sm:$0xff]  ;;  %v3735_v27 = vpop.permute.xlu1 %3734 }
 0xa67   : > { %v3776_v4 = vrot.slane %v3775_v44, 1  ;;  %v3785_v21 = vrot.slane %v3784_v15, 1  ;;  %v3807_v11 = vadd.f32 %v3806_v46, %v3805_v40  ;;  %v3814_v20 = vsel %vm656_vm1, %v3763_v25, 0.0 }
 0xa68   : > { %4828 = vrsqrt.f32 %v3551_v0  ;;  %v3793_v45 = vadd.f32 %v3792_v49, %v3791_v50  ;;  %v3801_v59 = vrot.slane %v3800_v2, 2  ;;  %v3815_v18 = vsel %vm656_vm1, %v3764_v5, 0.0 }
 0xa69   : > { %v3777_v8 = vadd.f32 %v3776_v4, %v3775_v44  ;;  %v3786_v12 = vadd.f32 %v3785_v21, %v3784_v15  ;;  %v3808_v63 = vrot.slane %v3807_v11, 4  ;;  %v3816_v13 = vadd.f32 %v3815_v18, %v3814_v20  ;;  %v6508_v15 = vld [vmem:[#allocation17_spill] sm:$0xff] }
 0xa6a   : > { %v3794_v7 = vrot.slane %v3793_v45, 1  ;;  %v3802_v37 = vadd.f32 %v3801_v59, %v3800_v2  ;;  %v3750_v30 = vmul.f32 %v6246_v58, %v3622_v56  ;;  %v3638_v39 = vmul.f32 %v6505_v43, %v6504_v60  ;;  %v6509_v56 = vld [vmem:[#allocation20_spill] sm:$0xff]  ;;  %v6510_v59 = vld [vmem:[#allocation15_spill] sm:$0xff] }
 0xa6b   : > { %v3809_v61 = vadd.f32 %v3808_v63, %v3807_v11  ;;  %v3841_v10 = vmul.f32 0.0625, %v3777_v8  ;;  %v3842_v32 = vmul.f32 0.0625, %v3786_v12  ;;  %v3817_v22 = vrot.slane %v3816_v13, 4  ;;  %v6511_v8 = vld [vmem:[#allocation19_spill] sm:$0xff] }
 0xa6c   : > { %v3795_v33 = vadd.f32 %v3794_v7, %v3793_v45  ;;  %v3803_v29 = vrot.slane %v3802_v37, 1  ;;  %v3766_v42 = vadd.f32 %v3750_v30, %v3638_v39  ;;  %v3637_v5 = vmul.f32 %v6507_v53, %v6506_v1  ;;  %v3730_v45 = vpop.permute.xlu0 %3729 }
 0xa6d   : > { %v3810_v3 = vrot.slane %v3809_v61, 2  ;;  %v3858_v41 = vsel %vm3857_vm4, %v3842_v32, %v3841_v10  ;;  %v3818_v6 = vadd.f32 %v3817_v22, %v3816_v13  ;;  %v3640_v0 = vmul.f32 %v6509_v56, %v6508_v15 }
 0xa6e   : > { %v4825_v34 = vpop.eup %4824  ;;  %v3804_v28 = vadd.f32 %v3803_v29, %v3802_v37  ;;  %v3843_v35 = vmul.f32 0.0625, %v3795_v33  ;;  %v3824_v21 = vsel %vm656_vm1, %v3766_v42, 0.0 }
 0xa6f   : > { %v4827_v24 = vpop.eup %4826  ;;  %v3581_v57 = vmul.f32 %v4825_v34, %v6221_v62  ;;  %v3811_v31 = vadd.f32 %v3810_v3, %v3809_v61  ;;  %v3819_v38 = vrot.slane %v3818_v6, 2 }
 0xa70   : > { %v3584_v50 = vmul.f32 %v4827_v24, %v6229_v51  ;;  %v3844_v9 = vmul.f32 0.0625, %v3804_v28  ;;  %v3860_v19 = vsel %vm3859_vm5, %v3843_v35, %v3858_v41 }
 0xa71   : > { %v3601_v52 = vmul.f32 %v6252_v14, %v3581_v57  ;;  %v3812_v55 = vrot.slane %v3811_v31, 1  ;;  %v3820_v36 = vadd.f32 %v3819_v38, %v3818_v6 }
 0xa72   : > { %v4829_v23 = vpop.eup %4828  ;;  %v3604_v54 = vmul.f32 %v6252_v14, %v3584_v50  ;;  %v3862_v58 = vsel %vm3861_vm6, %v3844_v9, %v3860_v19 }
 0xa73   : > { %v3621_v62 = vadd.f32 %v6256_v16, %v3601_v52  ;;  %v3583_v17 = vmul.f32 %v4829_v23, %v6233_v47  ;;  %v3813_v51 = vadd.f32 %v3812_v55, %v3811_v31  ;;  %v3821_v40 = vrot.slane %v3820_v36, 1 }
 0xa74   : > { %v3624_v46 = vadd.f32 %v6256_v16, %v3604_v54 }
 0xa75   : > { %v3749_v48 = vmul.f32 %v6244_v26, %v3621_v62  ;;  %v3603_v25 = vmul.f32 %v6252_v14, %v3583_v17  ;;  %v3845_v44 = vmul.f32 0.0625, %v3813_v51  ;;  %v3822_v2 = vadd.f32 %v3821_v40, %v3820_v36 }
 0xa76   : > { %v3752_v49 = vmul.f32 %v3735_v27, %v3624_v46  ;;  %v3639_v14 = vmul.f32 %v6511_v8, %v6510_v59 }
 0xa77   : > { %v3765_v47 = vadd.f32 %v3749_v48, %v3637_v5  ;;  %v3623_v4 = vadd.f32 %v6256_v16, %v3603_v25  ;;  %v3864_v11 = vsel %vm3863_vm7, %v3845_v44, %v3862_v58  ;;  %v3846_v26 = vmul.f32 0.0625, %v3822_v2 }
 0xa78   : > { %v3768_v20 = vadd.f32 %v3752_v49, %v3640_v0 }
 0xa79   : > { %v3751_v12 = vmul.f32 %v3730_v45, %v3623_v4  ;;  %v3823_v63 = vsel %vm656_vm1, %v3765_v47, 0.0  ;;  %v3866_v7 = vsel %vm3865_vm8, %v3846_v26, %v3864_v11 }
 0xa7a   : > { %v3825_v18 = vadd.f32 %v3824_v21, %v3823_v63  ;;  %v3833_v37 = vsel %vm656_vm1, %v3768_v20, 0.0 }
 0xa7b   : > { %v3767_v13 = vadd.f32 %v3751_v12, %v3639_v14 }
 0xa7c   : > { %v3826_v61 = vrot.slane %v3825_v18, 4 }
 0xa7d   : > { %v3832_v16 = vsel %vm656_vm1, %v3767_v13, 0.0 }
 0xa7e   : > { %v3834_v10 = vadd.f32 %v3833_v37, %v3832_v16  ;;  %v3827_v32 = vadd.f32 %v3826_v61, %v3825_v18 }
 0xa80   : > { %v3835_v33 = vrot.slane %v3834_v10, 4  ;;  %v3828_v29 = vrot.slane %v3827_v32, 2 }
 0xa82   : > { %v3836_v22 = vadd.f32 %v3835_v33, %v3834_v10  ;;  %v3829_v3 = vadd.f32 %v3828_v29, %v3827_v32 }
 0xa84   : > { %v3837_v41 = vrot.slane %v3836_v22, 2  ;;  %v3830_v34 = vrot.slane %v3829_v3, 1 }
 0xa86   : > { %v3838_v28 = vadd.f32 %v3837_v41, %v3836_v22  ;;  %v3831_v6 = vadd.f32 %v3830_v34, %v3829_v3 }
 0xa88   : > { %v3839_v35 = vrot.slane %v3838_v28, 1  ;;  %v3847_v24 = vmul.f32 0.0625, %v3831_v6 }
 0xa8a   : > { %v3840_v30 = vadd.f32 %v3839_v35, %v3838_v28  ;;  %v3868_v57 = vsel %vm3867_vm9, %v3847_v24, %v3866_v7 }
 0xa8c   : > { %v3848_v31 = vmul.f32 0.0625, %v3840_v30 }
 0xa8e   : > { %v3870_v50 = vsel %vm3869_vm10, %v3848_v31, %v3868_v57 }
 0xa8f   : > { %3872 = vst.msk [vmem:[%s339_s17] sm:$0xff] %vm656_vm1, %v3870_v50 }
 0xa90   : > { %4859 = shalt.err (!%p4856_p3)
}
 0xa91   : > { %s4860_s23 = scalar_lea.hbm %s6403_s18, 128  ;;  %s4864_s26 = scalar_lea.hbm %s6454_s8, 256 }
 0xa92   : > { %p4861_p4 = scmp.ne.s32.totalorder %s6403_s18, %s4860_s23  ;;  %p4865_p9 = scmp.lt.u32.totalorder %s6403_s18, %s6454_s8 }
 0xa93   : > { %p4866_p10 = scmp.lt.u32.totalorder %s4864_s26, %s4860_s23  ;;  %p4868_p12 = scmp.lt.u32.totalorder %s4860_s23, %s6403_s18 }
 0xa94   : > { %p4862_p7 = pnand %p4861_p4, %p4997_p5 }
 0xa95   : > { %p4867_p11 = por %p4866_p10, %p4865_p9 }
 0xa96   : > { %p4863_p8 = pneg %p4862_p7 }
 0xa97   : > { %p4869_p13 = por %p4868_p12, %p4867_p11 }
 0xa99   : > { %p4870_p0 = pnand %p4869_p13, %p4863_p8 }
 0xa9b   : > { %4873 = shalt.err (!%p4870_p0)
}
 0xa9c   : > { %4568 = dma.vmem_to_hbm [thread:$0]  (%p4997_p5), %s6405_s10, 128, %s6403_s18, %s3874_s19  }
 0xa9d PF: > { %p4574_p1 = scmp.ge.s32.totalorder %s4908_s30, 2  ;;  %s3899_s13 = sand.u32 1, %s4896_s27  }
 0xa9e   : > { %s3900_s20 = scalar_lea.sflag [#allocation3], %s3899_s13 }
 0xa9f   : > { %p4571_p2 = pnand %p4574_p1, %p5001_p6 }
 0xaa1   : > { %4891 = dma.done.wait (!%p4571_p2), %s3900_s20, 128  }
 0xaa2   : > { %4893 = vsyncadd (!%p4571_p2), %s3900_s20, 4294967168  ;;  %p18_p3 = scmp.ge.s32.totalorder %s4984_s11, 4   ;;  %s6512_s27 = smov %s4900_s28 }
 0xaa3   : > { %s6513_s28 = smov %s4904_s29  ;;  %s6514_s29 = smov %s4995_s14 }
 0xaa4   : > { %s6515_s30 = smov %s4984_s11  ;;  %20 = sbr.rel (!%p18_p3) target bundleno = 3 (0x3), region = 96 }
 0xaab   :  { %3905 = vsyncpa [#allocation3], 1 }
 0xaac   :  { %3907 = vsyncpa [#allocation3 + $0x1], 1 }

</bundles_post_ra>
